<compile_context>
chip_gen: v6e
topology: v6e:2x2x1
jax: 0.10.0
libtpu: 0.0.40
codegen_flags: <defaults>
</compile_context>

<pallas_src>
import functools

import jax
import jax.numpy as jnp
from jax.experimental import pallas as pl
from jax.experimental.pallas import tpu as pltpu

_EPS = 1e-5
_LANE = 128


def _basic_block_kernel(x_ref, w1_ref, g1_ref, b1_ref, w2_ref, g2_ref, b2_ref,
                        o_ref, patches_ref, *, shifts, inv_count, dims, mm_dtype):
    """BasicBlock forward on the lane-dense (C_pad, L_pad) layout.

    x_ref       : (C_pad, L_pad)    f32 input on the zero-padded spatial grid
    w*_ref      : (C_pad, 9*C_pad)  conv weights, tap-major [(di,dj), cin] cols,
                                    already in the matmul dtype (bf16 or f32)
    g*_ref,b*_ref: (C_pad, 1)       f32 BN gamma / beta
    o_ref       : (C_pad, L_pad)    f32 output (interior positions meaningful)
    patches_ref : (9*C_pad, L_pad)  persistent im2col scratch (matmul dtype),
                                    reused by conv1 and conv2
    """
    _, H, W, Hp, Wp, L = dims
    CP, Lpad = x_ref.shape

    x = x_ref[...]                      # conv1 input AND identity residual (f32)

    # ---- interior mask built in-kernel from iota (no mask DMA stream) -------
    # Exact floor-division by the small constants Wp/Hp via f32 divide + trunc:
    # all values are exact integers < 2^24, and quotients sit >=1/Wp away from
    # the next integer, so truncation is exact.
    lane = jax.lax.broadcasted_iota(jnp.int32, (1, Lpad), 1)
    lane_f = lane.astype(jnp.float32)
    r = (lane_f / float(Wp)).astype(jnp.int32)            # = n*Hp + i
    j = lane - r * Wp
    n_idx = (r.astype(jnp.float32) / float(Hp)).astype(jnp.int32)
    i = r - n_idx * Hp
    interior = (i >= 1) & (i <= H) & (j >= 1) & (j <= W) & (lane < L)
    mask = jnp.where(interior, jnp.float32(1.0), jnp.float32(0.0))   # (1, Lpad)

    def conv3x3(a, w_ref):
        # 3x3 / stride-1 conv on the padded grid as ONE im2col matmul: the nine
        # tap shifts are cyclic lane rotations (XLU slot).  Each tap is written
        # straight into the persistent patches scratch at its (tile-aligned)
        # sublane block — live range ends at the store, no 9-way concat, and
        # the cast to the matmul dtype happens as part of the store.
        for t, s in enumerate(shifts):
            tap = a if s == 0 else pltpu.roll(a, s, axis=1)
            patches_ref[t * CP:(t + 1) * CP, :] = tap.astype(mm_dtype)
        # bf16 x bf16 -> f32 is single-pass on the MXU on v5e/v6e/v7x.
        return jnp.dot(w_ref[...], patches_ref[...],
                       preferred_element_type=jnp.float32)    # (CP, Lpad) f32

    def bn(y, g_ref, b_ref):
        # Train-mode BN, fused, two-pass centered variance (biased, eps=1e-5).
        # All elementwise math in f32 (v5e has no bf16 VALU).
        ym = y * mask                                         # zero border/tail
        mean = jnp.sum(ym, axis=1, keepdims=True) * inv_count
        cen = (ym - mean) * mask
        var = jnp.sum(cen * cen, axis=1, keepdims=True) * inv_count
        scale = g_ref[...] * jax.lax.rsqrt(var + _EPS)
        bias = b_ref[...] - mean * scale
        return ym * scale + bias

    # conv1 -> bn1 -> relu ; re-mask so the padded border stays zero — that IS
    # the zero padding conv2 needs.
    y1 = jnp.maximum(bn(conv3x3(x, w1_ref), g1_ref, b1_ref), 0.0) * mask
    # conv2 -> bn2 -> +identity residual -> relu.  Border lanes hold garbage
    # and are discarded by the wrapper.
    y2 = bn(conv3x3(y1, w2_ref), g2_ref, b2_ref)
    o_ref[...] = jnp.maximum(y2 + x, 0.0).astype(o_ref.dtype)


def basic_block_forward(x_nchw, params, matmul_dtype=jnp.bfloat16):
    """Pallas BasicBlock forward.  Input/output are NCHW float32 (PyTorch layout).

    matmul_dtype: dtype of the MXU operands (weights + im2col patches).
    bf16 (default) is single-pass on the MXU on all generations; f32 is the
    bit-faithful verification path.  Accumulation/elementwise math is f32 either way.
    """
    N, Cin, H, W = x_nchw.shape
    C = params["w1"].shape[-1]
    assert Cin == C, "identity residual requires inplanes == planes"

    mm_dtype = jnp.dtype(matmul_dtype)
    # Channel padding = one full sublane tile of the matmul dtype, so every tap
    # store into the patches scratch is tile-aligned (8 rows f32 / 16 rows bf16).
    pack = 16 if mm_dtype == jnp.dtype(jnp.bfloat16) else 8
    CP = max(pack, ((C + pack - 1) // pack) * pack)

    Hp, Wp = H + 2, W + 2
    L = N * Hp * Wp
    Lpad = ((L + _LANE - 1) // _LANE) * _LANE               # lanes -> multiple of 128

    # ---- wrapper-side layout plumbing: NCHW -> lane-dense (C_pad, L_pad) ----
    xpad = jnp.pad(x_nchw, ((0, 0), (0, CP - Cin), (1, 1), (1, 1)))
    x2d = jnp.transpose(xpad, (1, 0, 2, 3)).reshape(CP, L)
    x2d = jnp.pad(x2d, ((0, 0), (0, Lpad - L)))             # stays f32 (residual)

    def pack_w(w):   # HWIO (3,3,Cin,C) -> tap-major (CP, 9*CP), matmul dtype
        wp = jnp.pad(w, ((0, 0), (0, 0), (0, CP - Cin), (0, CP - C)))
        return jnp.transpose(wp, (3, 0, 1, 2)).reshape(CP, 9 * CP).astype(mm_dtype)

    def pack_v(v):   # (C,) -> (CP, 1) f32
        return jnp.pad(v, (0, CP - C)).reshape(CP, 1)

    w1t, w2t = pack_w(params["w1"]), pack_w(params["w2"])
    g1, b1 = pack_v(params["g1"]), pack_v(params["b1"])
    g2, b2 = pack_v(params["g2"]), pack_v(params["b2"])

    # Tap (di,dj) -> lane-roll amount bringing x[l + (di-1)*Wp + (dj-1)] to lane l.
    # (interior reads never wrap across images / the tail, so cyclic roll is exact)
    shifts = tuple((-((di - 1) * Wp + (dj - 1))) % Lpad
                   for di in range(3) for dj in range(3))

    kernel = functools.partial(
        _basic_block_kernel, shifts=shifts, inv_count=1.0 / float(N * H * W),
        dims=(N, H, W, Hp, Wp, L), mm_dtype=mm_dtype)

    out2d = pl.pallas_call(
        kernel,
        out_shape=jax.ShapeDtypeStruct((CP, Lpad), jnp.float32),
        grid=(1,),
        in_specs=[
            pl.BlockSpec((CP, Lpad), lambda i: (0, 0)),       # x (padded grid, flattened)
            pl.BlockSpec((CP, 9 * CP), lambda i: (0, 0)),     # w1 (tap-major, mm dtype)
            pl.BlockSpec((CP, 1), lambda i: (0, 0)),          # gamma1
            pl.BlockSpec((CP, 1), lambda i: (0, 0)),          # beta1
            pl.BlockSpec((CP, 9 * CP), lambda i: (0, 0)),     # w2 (tap-major, mm dtype)
            pl.BlockSpec((CP, 1), lambda i: (0, 0)),          # gamma2
            pl.BlockSpec((CP, 1), lambda i: (0, 0)),          # beta2
        ],
        out_specs=pl.BlockSpec((CP, Lpad), lambda i: (0, 0)),
        scratch_shapes=[pltpu.VMEM((9 * CP, Lpad), mm_dtype)],  # shared im2col scratch
        compiler_params=pltpu.CompilerParams(
            dimension_semantics=("arbitrary",),
            # Tiny working set here (<2 MiB).  At real HRNet sizes re-derive the
            # tile budget per generation: v7x <= ~48 MiB of 64, v5e/v6e can use
            # up to ~100 MiB of 128 with larger L-tiles (see header TODO).
            vmem_limit_bytes=32 * 1024 * 1024),
    )(x2d, w1t, g1, b1, w2t, g2, b2)

    # ---- (C_pad, L_pad) -> NCHW: real channels, interior pixels only --------
    out = out2d[:C, :L].reshape(C, N, Hp, Wp)[:, :, 1:H + 1, 1:W + 1]
    return jnp.transpose(out, (1, 0, 2, 3))


def basic_block_reference(x_nchw, params):
    """Pure-JAX f32 reference (same train-mode BN semantics) for verification."""
    x = jnp.transpose(x_nchw, (0, 2, 3, 1))

    def conv(h, w):
        return jax.lax.conv_general_dilated(
            h, w, window_strides=(1, 1), padding=((1, 1), (1, 1)),
            dimension_numbers=("NHWC", "HWIO", "NHWC"))

    def bn(y, g, b):
        mean = jnp.mean(y, axis=(0, 1, 2), keepdims=True)
        var = jnp.mean((y - mean) ** 2, axis=(0, 1, 2), keepdims=True)
        return (y - mean) * jax.lax.rsqrt(var + _EPS) * g + b

    y = jax.nn.relu(bn(conv(x, params["w1"]), params["g1"], params["b1"]))
    y = bn(conv(y, params["w2"]), params["g2"], params["b2"])
    y = jax.nn.relu(y + x)
    return jnp.transpose(y, (0, 3, 1, 2))


if __name__ == "__main__":
    # Small shapes consistent with BasicBlock(inplanes=4, planes=4)
    N, Cin, H, W = 2, 4, 16, 16
    C = Cin  # planes

    key = jax.random.PRNGKey(0)
    kw1, kg1, kb1, kw2, kg2, kb2, kx = jax.random.split(key, 7)
    params = {
        "w1": 0.1 * jax.random.normal(kw1, (3, 3, Cin, C), jnp.float32),  # HWIO
        "g1": 1.0 + 0.1 * jax.random.normal(kg1, (C,), jnp.float32),
        "b1": 0.1 * jax.random.normal(kb1, (C,), jnp.float32),
        "w2": 0.1 * jax.random.normal(kw2, (3, 3, C, C), jnp.float32),
        "g2": 1.0 + 0.1 * jax.random.normal(kg2, (C,), jnp.float32),
        "b2": 0.1 * jax.random.normal(kb2, (C,), jnp.float32),
    }
    x = jax.random.normal(kx, (N, Cin, H, W), jnp.float32)

    ref = jax.block_until_ready(basic_block_reference(x, params))

    # Strict semantic check with f32 MXU operands (bit-close to the reference).
    out_f32 = jax.block_until_ready(
        basic_block_forward(x, params, matmul_dtype=jnp.float32))
    assert out_f32.shape == (N, C, H, W), out_f32.shape
    assert jnp.allclose(out_f32, ref, rtol=1e-3, atol=1e-3), \
        float(jnp.max(jnp.abs(out_f32 - ref)))

    # Default fast path: bf16 MXU operands (single-pass on the MXU on all
    # generations), verified at a bf16-appropriate tolerance.
    out = jax.block_until_ready(basic_block_forward(x, params))
    assert out.shape == (N, C, H, W), out.shape
    assert jnp.allclose(out, ref, rtol=5e-2, atol=5e-2), \
        float(jnp.max(jnp.abs(out - ref)))

    print("KERNEL_OK")
</pallas_src>

<mosaic_0001>
module attributes {stable_mosaic.version = 11 : i64} {
  func.func @_basic_block_kernel(%arg0: i32, %arg1: memref<8x768xf32, #tpu.memory_space<vmem>>, %arg2: memref<8x72xf32, #tpu.memory_space<vmem>>, %arg3: memref<8x1xf32, #tpu.memory_space<vmem>>, %arg4: memref<8x1xf32, #tpu.memory_space<vmem>>, %arg5: memref<8x72xf32, #tpu.memory_space<vmem>>, %arg6: memref<8x1xf32, #tpu.memory_space<vmem>>, %arg7: memref<8x1xf32, #tpu.memory_space<vmem>>, %arg8: memref<8x768xf32, #tpu.memory_space<vmem>>, %arg9: memref<72x768xf32, #tpu.memory_space<vmem>>) attributes {dimension_semantics = [#tpu.dimension_semantics<arbitrary>], iteration_bounds = array<i64: 1>, scalar_prefetch = 0 : i64, scratch_operands = 1 : i64, tpu.core_type = #tpu.core_type<tc>, window_params = [{pipeline_mode = #tpu.pipeline_mode<synchronous>, transform_indices = @transform_0, window_bounds = array<i64: 8, 768>}, {pipeline_mode = #tpu.pipeline_mode<synchronous>, transform_indices = @transform_1, window_bounds = array<i64: 8, 72>}, {pipeline_mode = #tpu.pipeline_mode<synchronous>, transform_indices = @transform_2, window_bounds = array<i64: 8, 1>}, {pipeline_mode = #tpu.pipeline_mode<synchronous>, transform_indices = @transform_3, window_bounds = array<i64: 8, 1>}, {pipeline_mode = #tpu.pipeline_mode<synchronous>, transform_indices = @transform_4, window_bounds = array<i64: 8, 72>}, {pipeline_mode = #tpu.pipeline_mode<synchronous>, transform_indices = @transform_5, window_bounds = array<i64: 8, 1>}, {pipeline_mode = #tpu.pipeline_mode<synchronous>, transform_indices = @transform_6, window_bounds = array<i64: 8, 1>}, {pipeline_mode = #tpu.pipeline_mode<synchronous>, transform_indices = @transform_7, window_bounds = array<i64: 8, 768>}]} {
    %c0 = arith.constant 0 : index
    %c0_0 = arith.constant 0 : index
    %0 = vector.load %arg1[%c0, %c0_0] : memref<8x768xf32, #tpu.memory_space<vmem>>, vector<8x768xf32>
    %1 = tpu.iota {dimensions = array<i32: 1>} : vector<1x768xi32>
    %2 = arith.sitofp %1 : vector<1x768xi32> to vector<1x768xf32>
    %cst = arith.constant 1.800000e+01 : f32
    %3 = vector.broadcast %cst : f32 to vector<1x768xf32>
    %4 = arith.divf %2, %3 : vector<1x768xf32>
    %5 = arith.fptosi %4 : vector<1x768xf32> to vector<1x768xi32>
    %c18_i32 = arith.constant 18 : i32
    %6 = vector.broadcast %c18_i32 : i32 to vector<1x768xi32>
    %7 = arith.muli %5, %6 : vector<1x768xi32>
    %8 = arith.subi %1, %7 : vector<1x768xi32>
    %9 = arith.sitofp %5 : vector<1x768xi32> to vector<1x768xf32>
    %cst_1 = arith.constant 1.800000e+01 : f32
    %10 = vector.broadcast %cst_1 : f32 to vector<1x768xf32>
    %11 = arith.divf %9, %10 : vector<1x768xf32>
    %12 = arith.fptosi %11 : vector<1x768xf32> to vector<1x768xi32>
    %c18_i32_2 = arith.constant 18 : i32
    %13 = vector.broadcast %c18_i32_2 : i32 to vector<1x768xi32>
    %14 = arith.muli %12, %13 : vector<1x768xi32>
    %15 = arith.subi %5, %14 : vector<1x768xi32>
    %c1_i32 = arith.constant 1 : i32
    %16 = vector.broadcast %c1_i32 : i32 to vector<1x768xi32>
    %17 = arith.cmpi sge, %15, %16 : vector<1x768xi32>
    %c16_i32 = arith.constant 16 : i32
    %18 = vector.broadcast %c16_i32 : i32 to vector<1x768xi32>
    %19 = arith.cmpi sle, %15, %18 : vector<1x768xi32>
    %20 = arith.andi %17, %19 : vector<1x768xi1>
    %c1_i32_3 = arith.constant 1 : i32
    %21 = vector.broadcast %c1_i32_3 : i32 to vector<1x768xi32>
    %22 = arith.cmpi sge, %8, %21 : vector<1x768xi32>
    %23 = arith.andi %20, %22 : vector<1x768xi1>
    %c16_i32_4 = arith.constant 16 : i32
    %24 = vector.broadcast %c16_i32_4 : i32 to vector<1x768xi32>
    %25 = arith.cmpi sle, %8, %24 : vector<1x768xi32>
    %26 = arith.andi %23, %25 : vector<1x768xi1>
    %c648_i32 = arith.constant 648 : i32
    %27 = vector.broadcast %c648_i32 : i32 to vector<1x768xi32>
    %28 = arith.cmpi slt, %1, %27 : vector<1x768xi32>
    %29 = arith.andi %26, %28 : vector<1x768xi1>
    %cst_5 = arith.constant 1.000000e+00 : f32
    %cst_6 = arith.constant 0.000000e+00 : f32
    %30 = vector.broadcast %cst_5 : f32 to vector<1x768xf32>
    %31 = vector.broadcast %cst_6 : f32 to vector<1x768xf32>
    %32 = arith.select %29, %30, %31 : vector<1x768xi1>, vector<1x768xf32>
    %c19_i32 = arith.constant 19 : i32
    %33 = tpu.dynamic_rotate %0 by %c19_i32 dim 1 : vector<8x768xf32>, i32 -> vector<8x768xf32>
    %c0_7 = arith.constant 0 : index
    %c0_8 = arith.constant 0 : index
    %34 = vector.load %arg9[%c0_7, %c0_8] : memref<72x768xf32, #tpu.memory_space<vmem>>, vector<8x768xf32>
    tpu.vector_store %arg9[%c0_7, %c0_8], %33 {strides = array<i32>} : memref<72x768xf32, #tpu.memory_space<vmem>>, vector<8x768xf32>,
    %c18_i32_9 = arith.constant 18 : i32
    %35 = tpu.dynamic_rotate %0 by %c18_i32_9 dim 1 : vector<8x768xf32>, i32 -> vector<8x768xf32>
    %c8 = arith.constant 8 : index
    %c0_10 = arith.constant 0 : index
    %36 = vector.load %arg9[%c8, %c0_10] : memref<72x768xf32, #tpu.memory_space<vmem>>, vector<8x768xf32>
    tpu.vector_store %arg9[%c8, %c0_10], %35 {strides = array<i32>} : memref<72x768xf32, #tpu.memory_space<vmem>>, vector<8x768xf32>,
    %c17_i32 = arith.constant 17 : i32
    %37 = tpu.dynamic_rotate %0 by %c17_i32 dim 1 : vector<8x768xf32>, i32 -> vector<8x768xf32>
    %c16 = arith.constant 16 : index
    %c0_11 = arith.constant 0 : index
    %38 = vector.load %arg9[%c16, %c0_11] : memref<72x768xf32, #tpu.memory_space<vmem>>, vector<8x768xf32>
    tpu.vector_store %arg9[%c16, %c0_11], %37 {strides = array<i32>} : memref<72x768xf32, #tpu.memory_space<vmem>>, vector<8x768xf32>,
    %c1_i32_12 = arith.constant 1 : i32
    %39 = tpu.dynamic_rotate %0 by %c1_i32_12 dim 1 : vector<8x768xf32>, i32 -> vector<8x768xf32>
    %c24 = arith.constant 24 : index
    %c0_13 = arith.constant 0 : index
    %40 = vector.load %arg9[%c24, %c0_13] : memref<72x768xf32, #tpu.memory_space<vmem>>, vector<8x768xf32>
    tpu.vector_store %arg9[%c24, %c0_13], %39 {strides = array<i32>} : memref<72x768xf32, #tpu.memory_space<vmem>>, vector<8x768xf32>,
    %c32 = arith.constant 32 : index
    %c0_14 = arith.constant 0 : index
    %41 = vector.load %arg9[%c32, %c0_14] : memref<72x768xf32, #tpu.memory_space<vmem>>, vector<8x768xf32>
    tpu.vector_store %arg9[%c32, %c0_14], %0 {strides = array<i32>} : memref<72x768xf32, #tpu.memory_space<vmem>>, vector<8x768xf32>,
    %c767_i32 = arith.constant 767 : i32
    %42 = tpu.dynamic_rotate %0 by %c767_i32 dim 1 : vector<8x768xf32>, i32 -> vector<8x768xf32>
    %c40 = arith.constant 40 : index
    %c0_15 = arith.constant 0 : index
    %43 = vector.load %arg9[%c40, %c0_15] : memref<72x768xf32, #tpu.memory_space<vmem>>, vector<8x768xf32>
    tpu.vector_store %arg9[%c40, %c0_15], %42 {strides = array<i32>} : memref<72x768xf32, #tpu.memory_space<vmem>>, vector<8x768xf32>,
    %c751_i32 = arith.constant 751 : i32
    %44 = tpu.dynamic_rotate %0 by %c751_i32 dim 1 : vector<8x768xf32>, i32 -> vector<8x768xf32>
    %c48 = arith.constant 48 : index
    %c0_16 = arith.constant 0 : index
    %45 = vector.load %arg9[%c48, %c0_16] : memref<72x768xf32, #tpu.memory_space<vmem>>, vector<8x768xf32>
    tpu.vector_store %arg9[%c48, %c0_16], %44 {strides = array<i32>} : memref<72x768xf32, #tpu.memory_space<vmem>>, vector<8x768xf32>,
    %c750_i32 = arith.constant 750 : i32
    %46 = tpu.dynamic_rotate %0 by %c750_i32 dim 1 : vector<8x768xf32>, i32 -> vector<8x768xf32>
    %c56 = arith.constant 56 : index
    %c0_17 = arith.constant 0 : index
    %47 = vector.load %arg9[%c56, %c0_17] : memref<72x768xf32, #tpu.memory_space<vmem>>, vector<8x768xf32>
    tpu.vector_store %arg9[%c56, %c0_17], %46 {strides = array<i32>} : memref<72x768xf32, #tpu.memory_space<vmem>>, vector<8x768xf32>,
    %c749_i32 = arith.constant 749 : i32
    %48 = tpu.dynamic_rotate %0 by %c749_i32 dim 1 : vector<8x768xf32>, i32 -> vector<8x768xf32>
    %c64 = arith.constant 64 : index
    %c0_18 = arith.constant 0 : index
    %49 = vector.load %arg9[%c64, %c0_18] : memref<72x768xf32, #tpu.memory_space<vmem>>, vector<8x768xf32>
    tpu.vector_store %arg9[%c64, %c0_18], %48 {strides = array<i32>} : memref<72x768xf32, #tpu.memory_space<vmem>>, vector<8x768xf32>,
    %c0_19 = arith.constant 0 : index
    %c0_20 = arith.constant 0 : index
    %50 = vector.load %arg2[%c0_19, %c0_20] : memref<8x72xf32, #tpu.memory_space<vmem>>, vector<8x72xf32>
    %c0_21 = arith.constant 0 : index
    %c0_22 = arith.constant 0 : index
    %51 = vector.load %arg9[%c0_21, %c0_22] : memref<72x768xf32, #tpu.memory_space<vmem>>, vector<72x768xf32>
    %cst_23 = arith.constant dense<0.000000e+00> : vector<8x768xf32>
    %52 = tpu.matmul %50, %51, %cst_23 {dimension_numbers = #tpu.dot_dimension_numbers<[1], [0], [0], [1], [0, 0, 1, 1], [], []>} : vector<8x72xf32>, vector<72x768xf32>, vector<8x768xf32> -> vector<8x768xf32>
    %53 = vector.broadcast %32 : vector<1x768xf32> to vector<8x768xf32>
    %54 = arith.mulf %52, %53 : vector<8x768xf32>
    %cst_24 = arith.constant dense<0.000000e+00> : vector<8xf32>
    %55 = vector.multi_reduction <add>, %54, %cst_24 [1] : vector<8x768xf32> to vector<8xf32>
    %56 = vector.shape_cast %55 : vector<8xf32> to vector<8x1xf32>
    %cst_25 = arith.constant 0.001953125 : f32
    %57 = vector.broadcast %cst_25 : f32 to vector<8x1xf32>
    %58 = arith.mulf %56, %57 : vector<8x1xf32>
    %59 = vector.broadcast %58 : vector<8x1xf32> to vector<8x768xf32>
    %60 = arith.subf %54, %59 : vector<8x768xf32>
    %61 = vector.broadcast %32 : vector<1x768xf32> to vector<8x768xf32>
    %62 = arith.mulf %60, %61 : vector<8x768xf32>
    %63 = arith.mulf %62, %62 : vector<8x768xf32>
    %cst_26 = arith.constant dense<0.000000e+00> : vector<8xf32>
    %64 = vector.multi_reduction <add>, %63, %cst_26 [1] : vector<8x768xf32> to vector<8xf32>
    %65 = vector.shape_cast %64 : vector<8xf32> to vector<8x1xf32>
    %cst_27 = arith.constant 0.001953125 : f32
    %66 = vector.broadcast %cst_27 : f32 to vector<8x1xf32>
    %67 = arith.mulf %65, %66 : vector<8x1xf32>
    %c0_28 = arith.constant 0 : index
    %c0_29 = arith.constant 0 : index
    %68 = vector.load %arg3[%c0_28, %c0_29] : memref<8x1xf32, #tpu.memory_space<vmem>>, vector<8x1xf32>
    %cst_30 = arith.constant 9.99999974E-6 : f32
    %69 = vector.broadcast %cst_30 : f32 to vector<8x1xf32>
    %70 = arith.addf %67, %69 : vector<8x1xf32>
    %71 = math.rsqrt %70 : vector<8x1xf32>
    %72 = arith.mulf %68, %71 : vector<8x1xf32>
    %c0_31 = arith.constant 0 : index
    %c0_32 = arith.constant 0 : index
    %73 = vector.load %arg4[%c0_31, %c0_32] : memref<8x1xf32, #tpu.memory_space<vmem>>, vector<8x1xf32>
    %74 = arith.mulf %58, %72 : vector<8x1xf32>
    %75 = arith.subf %73, %74 : vector<8x1xf32>
    %76 = vector.broadcast %72 : vector<8x1xf32> to vector<8x768xf32>
    %77 = arith.mulf %54, %76 : vector<8x768xf32>
    %78 = vector.broadcast %75 : vector<8x1xf32> to vector<8x768xf32>
    %79 = arith.addf %77, %78 : vector<8x768xf32>
    %cst_33 = arith.constant 0.000000e+00 : f32
    %80 = vector.broadcast %cst_33 : f32 to vector<8x768xf32>
    %81 = arith.maximumf %79, %80 : vector<8x768xf32>
    %82 = vector.broadcast %32 : vector<1x768xf32> to vector<8x768xf32>
    %83 = arith.mulf %81, %82 : vector<8x768xf32>
    %c19_i32_34 = arith.constant 19 : i32
    %84 = tpu.dynamic_rotate %83 by %c19_i32_34 dim 1 : vector<8x768xf32>, i32 -> vector<8x768xf32>
    %c0_35 = arith.constant 0 : index
    %c0_36 = arith.constant 0 : index
    %85 = vector.load %arg9[%c0_35, %c0_36] : memref<72x768xf32, #tpu.memory_space<vmem>>, vector<8x768xf32>
    tpu.vector_store %arg9[%c0_35, %c0_36], %84 {strides = array<i32>} : memref<72x768xf32, #tpu.memory_space<vmem>>, vector<8x768xf32>,
    %c18_i32_37 = arith.constant 18 : i32
    %86 = tpu.dynamic_rotate %83 by %c18_i32_37 dim 1 : vector<8x768xf32>, i32 -> vector<8x768xf32>
    %c8_38 = arith.constant 8 : index
    %c0_39 = arith.constant 0 : index
    %87 = vector.load %arg9[%c8_38, %c0_39] : memref<72x768xf32, #tpu.memory_space<vmem>>, vector<8x768xf32>
    tpu.vector_store %arg9[%c8_38, %c0_39], %86 {strides = array<i32>} : memref<72x768xf32, #tpu.memory_space<vmem>>, vector<8x768xf32>,
    %c17_i32_40 = arith.constant 17 : i32
    %88 = tpu.dynamic_rotate %83 by %c17_i32_40 dim 1 : vector<8x768xf32>, i32 -> vector<8x768xf32>
    %c16_41 = arith.constant 16 : index
    %c0_42 = arith.constant 0 : index
    %89 = vector.load %arg9[%c16_41, %c0_42] : memref<72x768xf32, #tpu.memory_space<vmem>>, vector<8x768xf32>
    tpu.vector_store %arg9[%c16_41, %c0_42], %88 {strides = array<i32>} : memref<72x768xf32, #tpu.memory_space<vmem>>, vector<8x768xf32>,
    %c1_i32_43 = arith.constant 1 : i32
    %90 = tpu.dynamic_rotate %83 by %c1_i32_43 dim 1 : vector<8x768xf32>, i32 -> vector<8x768xf32>
    %c24_44 = arith.constant 24 : index
    %c0_45 = arith.constant 0 : index
    %91 = vector.load %arg9[%c24_44, %c0_45] : memref<72x768xf32, #tpu.memory_space<vmem>>, vector<8x768xf32>
    tpu.vector_store %arg9[%c24_44, %c0_45], %90 {strides = array<i32>} : memref<72x768xf32, #tpu.memory_space<vmem>>, vector<8x768xf32>,
    %c32_46 = arith.constant 32 : index
    %c0_47 = arith.constant 0 : index
    %92 = vector.load %arg9[%c32_46, %c0_47] : memref<72x768xf32, #tpu.memory_space<vmem>>, vector<8x768xf32>
    tpu.vector_store %arg9[%c32_46, %c0_47], %83 {strides = array<i32>} : memref<72x768xf32, #tpu.memory_space<vmem>>, vector<8x768xf32>,
    %c767_i32_48 = arith.constant 767 : i32
    %93 = tpu.dynamic_rotate %83 by %c767_i32_48 dim 1 : vector<8x768xf32>, i32 -> vector<8x768xf32>
    %c40_49 = arith.constant 40 : index
    %c0_50 = arith.constant 0 : index
    %94 = vector.load %arg9[%c40_49, %c0_50] : memref<72x768xf32, #tpu.memory_space<vmem>>, vector<8x768xf32>
    tpu.vector_store %arg9[%c40_49, %c0_50], %93 {strides = array<i32>} : memref<72x768xf32, #tpu.memory_space<vmem>>, vector<8x768xf32>,
    %c751_i32_51 = arith.constant 751 : i32
    %95 = tpu.dynamic_rotate %83 by %c751_i32_51 dim 1 : vector<8x768xf32>, i32 -> vector<8x768xf32>
    %c48_52 = arith.constant 48 : index
    %c0_53 = arith.constant 0 : index
    %96 = vector.load %arg9[%c48_52, %c0_53] : memref<72x768xf32, #tpu.memory_space<vmem>>, vector<8x768xf32>
    tpu.vector_store %arg9[%c48_52, %c0_53], %95 {strides = array<i32>} : memref<72x768xf32, #tpu.memory_space<vmem>>, vector<8x768xf32>,
    %c750_i32_54 = arith.constant 750 : i32
    %97 = tpu.dynamic_rotate %83 by %c750_i32_54 dim 1 : vector<8x768xf32>, i32 -> vector<8x768xf32>
    %c56_55 = arith.constant 56 : index
    %c0_56 = arith.constant 0 : index
    %98 = vector.load %arg9[%c56_55, %c0_56] : memref<72x768xf32, #tpu.memory_space<vmem>>, vector<8x768xf32>
    tpu.vector_store %arg9[%c56_55, %c0_56], %97 {strides = array<i32>} : memref<72x768xf32, #tpu.memory_space<vmem>>, vector<8x768xf32>,
    %c749_i32_57 = arith.constant 749 : i32
    %99 = tpu.dynamic_rotate %83 by %c749_i32_57 dim 1 : vector<8x768xf32>, i32 -> vector<8x768xf32>
    %c64_58 = arith.constant 64 : index
    %c0_59 = arith.constant 0 : index
    %100 = vector.load %arg9[%c64_58, %c0_59] : memref<72x768xf32, #tpu.memory_space<vmem>>, vector<8x768xf32>
    tpu.vector_store %arg9[%c64_58, %c0_59], %99 {strides = array<i32>} : memref<72x768xf32, #tpu.memory_space<vmem>>, vector<8x768xf32>,
    %c0_60 = arith.constant 0 : index
    %c0_61 = arith.constant 0 : index
    %101 = vector.load %arg5[%c0_60, %c0_61] : memref<8x72xf32, #tpu.memory_space<vmem>>, vector<8x72xf32>
    %c0_62 = arith.constant 0 : index
    %c0_63 = arith.constant 0 : index
    %102 = vector.load %arg9[%c0_62, %c0_63] : memref<72x768xf32, #tpu.memory_space<vmem>>, vector<72x768xf32>
    %cst_64 = arith.constant dense<0.000000e+00> : vector<8x768xf32>
    %103 = tpu.matmul %101, %102, %cst_64 {dimension_numbers = #tpu.dot_dimension_numbers<[1], [0], [0], [1], [0, 0, 1, 1], [], []>} : vector<8x72xf32>, vector<72x768xf32>, vector<8x768xf32> -> vector<8x768xf32>
    %104 = vector.broadcast %32 : vector<1x768xf32> to vector<8x768xf32>
    %105 = arith.mulf %103, %104 : vector<8x768xf32>
    %cst_65 = arith.constant dense<0.000000e+00> : vector<8xf32>
    %106 = vector.multi_reduction <add>, %105, %cst_65 [1] : vector<8x768xf32> to vector<8xf32>
    %107 = vector.shape_cast %106 : vector<8xf32> to vector<8x1xf32>
    %cst_66 = arith.constant 0.001953125 : f32
    %108 = vector.broadcast %cst_66 : f32 to vector<8x1xf32>
    %109 = arith.mulf %107, %108 : vector<8x1xf32>
    %110 = vector.broadcast %109 : vector<8x1xf32> to vector<8x768xf32>
    %111 = arith.subf %105, %110 : vector<8x768xf32>
    %112 = vector.broadcast %32 : vector<1x768xf32> to vector<8x768xf32>
    %113 = arith.mulf %111, %112 : vector<8x768xf32>
    %114 = arith.mulf %113, %113 : vector<8x768xf32>
    %cst_67 = arith.constant dense<0.000000e+00> : vector<8xf32>
    %115 = vector.multi_reduction <add>, %114, %cst_67 [1] : vector<8x768xf32> to vector<8xf32>
    %116 = vector.shape_cast %115 : vector<8xf32> to vector<8x1xf32>
    %cst_68 = arith.constant 0.001953125 : f32
    %117 = vector.broadcast %cst_68 : f32 to vector<8x1xf32>
    %118 = arith.mulf %116, %117 : vector<8x1xf32>
    %c0_69 = arith.constant 0 : index
    %c0_70 = arith.constant 0 : index
    %119 = vector.load %arg6[%c0_69, %c0_70] : memref<8x1xf32, #tpu.memory_space<vmem>>, vector<8x1xf32>
    %cst_71 = arith.constant 9.99999974E-6 : f32
    %120 = vector.broadcast %cst_71 : f32 to vector<8x1xf32>
    %121 = arith.addf %118, %120 : vector<8x1xf32>
    %122 = math.rsqrt %121 : vector<8x1xf32>
    %123 = arith.mulf %119, %122 : vector<8x1xf32>
    %c0_72 = arith.constant 0 : index
    %c0_73 = arith.constant 0 : index
    %124 = vector.load %arg7[%c0_72, %c0_73] : memref<8x1xf32, #tpu.memory_space<vmem>>, vector<8x1xf32>
    %125 = arith.mulf %109, %123 : vector<8x1xf32>
    %126 = arith.subf %124, %125 : vector<8x1xf32>
    %127 = vector.broadcast %123 : vector<8x1xf32> to vector<8x768xf32>
    %128 = arith.mulf %105, %127 : vector<8x768xf32>
    %129 = vector.broadcast %126 : vector<8x1xf32> to vector<8x768xf32>
    %130 = arith.addf %128, %129 : vector<8x768xf32>
    %131 = arith.addf %130, %0 : vector<8x768xf32>
    %cst_74 = arith.constant 0.000000e+00 : f32
    %132 = vector.broadcast %cst_74 : f32 to vector<8x768xf32>
    %133 = arith.maximumf %131, %132 : vector<8x768xf32>
    %c0_75 = arith.constant 0 : index
    %c0_76 = arith.constant 0 : index
    %134 = vector.load %arg8[%c0_75, %c0_76] : memref<8x768xf32, #tpu.memory_space<vmem>>, vector<8x768xf32>
    tpu.vector_store %arg8[%c0_75, %c0_76], %133 {strides = array<i32>} : memref<8x768xf32, #tpu.memory_space<vmem>>, vector<8x768xf32>,
    return
  }
  func.func @transform_0(%arg0: i32) -> (i32, i32) {
    %c0_i32 = arith.constant 0 : i32
    %c0_i32_0 = arith.constant 0 : i32
    %c0_i32_1 = arith.constant 0 : i32
    return %c0_i32, %c0_i32_0 : i32, i32
  }
  func.func @transform_1(%arg0: i32) -> (i32, i32) {
    %c0_i32 = arith.constant 0 : i32
    %c0_i32_0 = arith.constant 0 : i32
    %c0_i32_1 = arith.constant 0 : i32
    return %c0_i32, %c0_i32_0 : i32, i32
  }
  func.func @transform_2(%arg0: i32) -> (i32, i32) {
    %c0_i32 = arith.constant 0 : i32
    %c0_i32_0 = arith.constant 0 : i32
    %c0_i32_1 = arith.constant 0 : i32
    return %c0_i32, %c0_i32_0 : i32, i32
  }
  func.func @transform_3(%arg0: i32) -> (i32, i32) {
    %c0_i32 = arith.constant 0 : i32
    %c0_i32_0 = arith.constant 0 : i32
    %c0_i32_1 = arith.constant 0 : i32
    return %c0_i32, %c0_i32_0 : i32, i32
  }
  func.func @transform_4(%arg0: i32) -> (i32, i32) {
    %c0_i32 = arith.constant 0 : i32
    %c0_i32_0 = arith.constant 0 : i32
    %c0_i32_1 = arith.constant 0 : i32
    return %c0_i32, %c0_i32_0 : i32, i32
  }
  func.func @transform_5(%arg0: i32) -> (i32, i32) {
    %c0_i32 = arith.constant 0 : i32
    %c0_i32_0 = arith.constant 0 : i32
    %c0_i32_1 = arith.constant 0 : i32
    return %c0_i32, %c0_i32_0 : i32, i32
  }
  func.func @transform_6(%arg0: i32) -> (i32, i32) {
    %c0_i32 = arith.constant 0 : i32
    %c0_i32_0 = arith.constant 0 : i32
    %c0_i32_1 = arith.constant 0 : i32
    return %c0_i32, %c0_i32_0 : i32, i32
  }
  func.func @transform_7(%arg0: i32) -> (i32, i32) {
    %c0_i32 = arith.constant 0 : i32
    %c0_i32_0 = arith.constant 0 : i32
    %c0_i32_1 = arith.constant 0 : i32
    return %c0_i32, %c0_i32_0 : i32, i32
  }
}

</mosaic_0001>

<bundles_post_ra>
// kernel: tpu_custom_call.1
= control target key start
LH: loop header
LB: loop body
LE: loop exit
PB: predicated region body
PF: predicated region fallthrough
CT: control target
= control target key end

     0   :  { %12 = vsyncpa [#allocation4], 0  ;;  %s2163_s0 = inlined_call_operand.hbm [shape: f32[8,768], index: 0, kind: input, shape index: {}]   ;;  %s2164_s1 = inlined_call_operand.vmem [shape: f32[8,72], index: 1, kind: input, shape index: {}]   ;;  %s2165_s2 = inlined_call_operand.vmem [shape: f32[8,1], index: 2, kind: input, shape index: {}]   ;;  %s2166_s3 = inlined_call_operand.vmem [shape: f32[8,1], index: 3, kind: input, shape index: {}]   ;;  %s2167_s4 = inlined_call_operand.vmem [shape: f32[8,72], index: 4, kind: input, shape index: {}]   ;;  %s2168_s5 = inlined_call_operand.vmem [shape: f32[8,1], index: 5, kind: input, shape index: {}]   ;;  %s2169_s6 = inlined_call_operand.vmem [shape: f32[8,1], index: 6, kind: input, shape index: {}]   ;;  %s2170_s7 = inlined_call_operand.hbm [shape: f32[8,768], index: 7, kind: output, shape index: {}]  }
   0x1   :  { %13 = vsyncpa [#allocation5], 0  ;;  %s1401_s24 = smov [#allocation3]  }
   0x2   :  { %s20_s25 = sshll.u32 %s1401_s24, 4  ;;  %s21_s25 = int_to_ptr.vmem [resolvable:$true] %s20_s25 }
   0x3   :  { %s1365_s26 = scalar_lea.vmem %s21_s25, 768  ;;  %p1370_p1 = scmp.lt.s32.totalorder %s21_s25, %s21_s25 }
   0x4   :  { %p1366_p0 = scmp.ne.s32.totalorder %s21_s25, %s1365_s26  ;;  %p1371_p2 = scmp.lt.s32.totalorder %s1365_s26, %s1365_s26 }
   0x6   :  { %p1372_p3 = por %p1371_p2, %p1370_p1 }
   0x8   :  { %p1373_p4 = pnand %p1372_p3, %p1366_p0 }
   0xa   :  { %1376 = shalt.err (!%p1373_p4)
}
   0xb   :  { %23 = dma.hbm_to_vmem [thread:$0]  %s2163_s0, 768, %s21_s25, [#allocation4]  }
   0xc   :  { %1397 = dma.done.wait [#allocation4], 768  }
   0xd   :  { %1398 = vsyncadd [#allocation4], 4294966528  ;;  %v1456_v0 = vld [vmem:[#allocation3 + $0x8] sm:$0xff]  ;;  %v1458_v1 = vld [vmem:[#allocation3] sm:$0xff]  ;;  %s1402_s29 = smov 109   ;;  %s1403_s30 = smov 110   ;;  %v45_v7 = vlaneseq }
   0xe   :  { %356 = vrot.lane.b32.xlu0 %v1456_v0, %s1402_s29  ;;  %354 = vrot.lane.b32.xlu1 %v1458_v1, %s1402_s29  ;;  %v1464_v2 = vld [vmem:[#allocation3 + $0x10] sm:$0xff]  ;;  %s1404_s0 = smov 111   ;;  %s1405_s8 = smov 127   ;;  %v1490_v3 = vld [vmem:[#allocation3 + $0x28] sm:$0xff]  ;;  %v1504_v4 = vld [vmem:[#allocation3 + $0x18] sm:$0xff]  ;;  %v1410_v6 = vmov 0.0  }
   0xf   :  { %s1406_s9 = smov 1   ;;  %s1407_s10 = smov 17   ;;  %v1506_v5 = vld [vmem:[#allocation3 + $0x20] sm:$0xff]  ;;  %502 = vmatprep.mubr.f32.mxu0 %v1410_v6  ;;  %573 = vmatprep.mubr.f32.mxu1 %v1410_v6  ;;  %v1566_v8 = vand.u32 127, %v45_v7  ;;  %vm2171_vm8 = vcmask 588800  }
  0x10   :  { %s1408_s11 = smov 18   ;;  %s1409_s12 = smov 19   ;;  %v1659_v54 = vld [vmem:[%s2164_s1] sm:$0xff] }
  0x11   :  { %vm2179_vm0 = vcmp.lt.s32.totalorder %v1566_v8, 109  ;;  %vm2178_vm1 = vcmp.lt.s32.totalorder %v1566_v8, 110  ;;  %vm2177_vm2 = vcmp.lt.s32.totalorder %v1566_v8, 111  ;;  %vm2176_vm3 = vcmp.lt.s32.totalorder %v1566_v8, 127 }
  0x12   :  { %358 = vrot.lane.b32.xlu0 %v1464_v2, %s1402_s29  ;;  %331 = vrot.lane.b32.xlu1 %v1456_v0, %s1403_s30  ;;  %vm2175_vm4 = vcmp.lt.s32.totalorder %v1566_v8, 1  ;;  %vm2174_vm5 = vcmp.lt.s32.totalorder %v1566_v8, 17  ;;  %vm2173_vm6 = vcmp.lt.s32.totalorder %v1566_v8, 18  ;;  %vm2172_vm7 = vcmp.lt.s32.totalorder %v1566_v8, 19 }
  0x16   :  { %333 = vrot.lane.b32.xlu0 %v1464_v2, %s1403_s30  ;;  %329 = vrot.lane.b32.xlu1 %v1458_v1, %s1403_s30 }
  0x1a   :  { %306 = vrot.lane.b32.xlu0 %v1456_v0, %s1404_s0  ;;  %308 = vrot.lane.b32.xlu1 %v1464_v2, %s1404_s0 }
  0x1e   :  { %304 = vrot.lane.b32.xlu0 %v1458_v1, %s1404_s0  ;;  %281 = vrot.lane.b32.xlu1 %v1456_v0, %s1405_s8 }
  0x22   :  { %283 = vrot.lane.b32.xlu0 %v1464_v2, %s1405_s8  ;;  %279 = vrot.lane.b32.xlu1 %v1458_v1, %s1405_s8 }
  0x26   :  { %248 = vrot.lane.b32.xlu0 %v1458_v1, %s1406_s9  ;;  %250 = vrot.lane.b32.xlu1 %v1456_v0, %s1406_s9 }
  0x2a   :  { %258 = vrot.lane.b32.xlu0 %v1490_v3, %s1406_s9  ;;  %223 = vrot.lane.b32.xlu1 %v1458_v1, %s1407_s10 }
  0x2e   :  { %225 = vrot.lane.b32.xlu0 %v1456_v0, %s1407_s10  ;;  %233 = vrot.lane.b32.xlu1 %v1490_v3, %s1407_s10 }
  0x32   :  { %198 = vrot.lane.b32.xlu0 %v1458_v1, %s1408_s11  ;;  %200 = vrot.lane.b32.xlu1 %v1456_v0, %s1408_s11 }
  0x36   :  { %360 = vrot.lane.b32.xlu0 %v1504_v4, %s1402_s29  ;;  %362 = vrot.lane.b32.xlu1 %v1506_v5, %s1402_s29 }
  0x3a   :  { %208 = vrot.lane.b32.xlu0 %v1490_v3, %s1408_s11  ;;  %173 = vrot.lane.b32.xlu1 %v1458_v1, %s1409_s12 }
  0x3e   :  { %175 = vrot.lane.b32.xlu0 %v1456_v0, %s1409_s12  ;;  %335 = vrot.lane.b32.xlu1 %v1504_v4, %s1403_s30 }
  0x42   :  { %337 = vrot.lane.b32.xlu0 %v1506_v5, %s1403_s30  ;;  %183 = vrot.lane.b32.xlu1 %v1490_v3, %s1409_s12 }
  0x46   :  { %310 = vrot.lane.b32.xlu0 %v1504_v4, %s1404_s0  ;;  %312 = vrot.lane.b32.xlu1 %v1506_v5, %s1404_s0 }
  0x4a   :  { %364 = vrot.lane.b32.xlu0 %v1490_v3, %s1402_s29  ;;  %285 = vrot.lane.b32.xlu1 %v1504_v4, %s1405_s8 }
  0x4e   :  { %287 = vrot.lane.b32.xlu0 %v1506_v5, %s1405_s8  ;;  %339 = vrot.lane.b32.xlu1 %v1490_v3, %s1403_s30 }
  0x52   :  { %314 = vrot.lane.b32.xlu0 %v1490_v3, %s1404_s0  ;;  %252 = vrot.lane.b32.xlu1 %v1464_v2, %s1406_s9 }
  0x56   :  { %254 = vrot.lane.b32.xlu0 %v1504_v4, %s1406_s9  ;;  %289 = vrot.lane.b32.xlu1 %v1490_v3, %s1405_s8 }
  0x5a   :  { %227 = vrot.lane.b32.xlu0 %v1464_v2, %s1407_s10  ;;  %229 = vrot.lane.b32.xlu1 %v1504_v4, %s1407_s10 }
  0x5e   :  { %202 = vrot.lane.b32.xlu0 %v1464_v2, %s1408_s11  ;;  %204 = vrot.lane.b32.xlu1 %v1504_v4, %s1408_s11 }
  0x62   :  { %256 = vrot.lane.b32.xlu0 %v1506_v5, %s1406_s9  ;;  %177 = vrot.lane.b32.xlu1 %v1464_v2, %s1409_s12 }
  0x66   :  { %179 = vrot.lane.b32.xlu0 %v1504_v4, %s1409_s12  ;;  %231 = vrot.lane.b32.xlu1 %v1506_v5, %s1407_s10 }
  0x6a   :  { %206 = vrot.lane.b32.xlu0 %v1506_v5, %s1408_s11  ;;  %181 = vrot.lane.b32.xlu1 %v1506_v5, %s1409_s12 }
  0x80   :  { %v357_v9 = vpop.permute.xlu0 %356  ;;  %v1568_v10 = vpop.permute.xlu1 %354 }
  0x81   :  { %v371_v14 = vsel %vm2179_vm0, %v1568_v10, %v357_v9 }
  0x84   :  { %v359_v11 = vpop.permute.xlu0 %358  ;;  %v332_v12 = vpop.permute.xlu1 %331 }
  0x85   :  { %v370_v13 = vsel %vm2179_vm0, %v357_v9, %v359_v11 }
  0x86   :  { %452 = vmatprep.subr.mxu0 %v370_v13 }
  0x87   :  { %453 = vmatpush1.msra.mxu0 %v371_v14 }
  0x88   :  { %v1577_v15 = vpop.permute.xlu0 %333  ;;  %v1579_v16 = vpop.permute.xlu1 %329 }
  0x89   :  { %v345_v17 = vsel %vm2178_vm1, %v332_v12, %v1577_v15  ;;  %v346_v18 = vsel %vm2178_vm1, %v1579_v16, %v332_v12 }
  0x8a   :  { %454 = vmatprep.subr.mxu0 %v345_v17 }
  0x8b   :  { %455 = vmatpush1.msra.mxu0 %v346_v18 }
  0x8c   :  { %v307_v19 = vpop.permute.xlu0 %306  ;;  %v1588_v20 = vpop.permute.xlu1 %308 }
  0x8d   :  { %v320_v21 = vsel %vm2177_vm2, %v307_v19, %v1588_v20 }
  0x8e   :  { %456 = vmatprep.subr.mxu0 %v320_v21 }
  0x90   :  { %v1593_v22 = vpop.permute.xlu0 %304  ;;  %v282_v23 = vpop.permute.xlu1 %281 }
  0x91   :  { %v321_v24 = vsel %vm2177_vm2, %v1593_v22, %v307_v19 }
  0x92   :  { %457 = vmatpush1.msra.mxu0 %v321_v24 }
  0x94   :  { %v1599_v25 = vpop.permute.xlu0 %283  ;;  %v1601_v26 = vpop.permute.xlu1 %279 }
  0x95   :  { %v295_v27 = vsel %vm2176_vm3, %v282_v23, %v1599_v25  ;;  %v296_v28 = vsel %vm2176_vm3, %v1601_v26, %v282_v23 }
  0x96   :  { %458 = vmatprep.subr.mxu0 %v295_v27 }
  0x97   :  { %459 = vmatpush1.msra.mxu0 %v296_v28 }
  0x98   :  { %v249_v29 = vpop.permute.xlu0 %248  ;;  %460 = vmatprep.subr.mxu0 %v1456_v0  ;;  %v1611_v30 = vpop.permute.xlu1 %250 }
  0x99   :  { %461 = vmatpush1.msra.mxu0 %v1458_v1  ;;  %v265_v31 = vsel %vm2175_vm4, %v249_v29, %v1611_v30 }
  0x9a   :  { %462 = vmatprep.subr.mxu0 %v265_v31 }
  0x9c   :  { %v1617_v32 = vpop.permute.xlu0 %258  ;;  %v224_v33 = vpop.permute.xlu1 %223 }
  0x9d   :  { %v266_v34 = vsel %vm2175_vm4, %v1617_v32, %v249_v29 }
  0x9e   :  { %463 = vmatpush1.msra.mxu0 %v266_v34 }
  0xa0   :  { %v1623_v35 = vpop.permute.xlu0 %225  ;;  %v1625_v36 = vpop.permute.xlu1 %233 }
  0xa1   :  { %v240_v37 = vsel %vm2174_vm5, %v224_v33, %v1623_v35  ;;  %v241_v38 = vsel %vm2174_vm5, %v1625_v36, %v224_v33 }
  0xa2   :  { %464 = vmatprep.subr.mxu0 %v240_v37 }
  0xa3   :  { %465 = vmatpush1.msra.mxu0 %v241_v38 }
  0xa4   :  { %v199_v39 = vpop.permute.xlu0 %198  ;;  %v1634_v40 = vpop.permute.xlu1 %200 }
  0xa5   :  { %v215_v41 = vsel %vm2173_vm6, %v199_v39, %v1634_v40 }
  0xa6   :  { %466 = vmatprep.subr.mxu0 %v215_v41 }
  0xa8   :  { %v361_v42 = vpop.permute.xlu0 %360  ;;  %v363_v43 = vpop.permute.xlu1 %362 }
  0xa9   :  { %v368_v44 = vsel %vm2179_vm0, %v361_v42, %v363_v43  ;;  %v369_v45 = vsel %vm2179_vm0, %v359_v11, %v361_v42 }
  0xaa   :  { %523 = vmatprep.subr.mxu1 %v368_v44  ;;  %v52_v44 = vcvt.s32.f32 %v1566_v8 }
  0xab   :  { %524 = vmatpush1.msra.mxu1 %v369_v45  ;;  %v1754_v45 = vadd.s32 128, %v1566_v8 }
  0xac   :  { %v1643_v46 = vpop.permute.xlu0 %208  ;;  %v174_v47 = vpop.permute.xlu1 %173 }
  0xad   :  { %v216_v48 = vsel %vm2173_vm6, %v1643_v46, %v199_v39 }
  0xae   :  { %467 = vmatpush1.msra.mxu0 %v216_v48  ;;  %v53_v48 = vcvt.s32.f32 %v1754_v45 }
  0xb0   :  { %v1649_v49 = vpop.permute.xlu0 %175  ;;  %v336_v50 = vpop.permute.xlu1 %335 }
  0xb1   :  { %v190_v51 = vsel %vm2172_vm7, %v174_v47, %v1649_v49  ;;  %v344_v57 = vsel %vm2178_vm1, %v1577_v15, %v336_v50 }
  0xb2   :  { %468 = vmatprep.subr.mxu0 %v190_v51 }
  0xb4   :  { %v338_v52 = vpop.permute.xlu0 %337  ;;  %v1654_v53 = vpop.permute.xlu1 %183 }
  0xb5   :  { %v191_v55 = vsel %vm2172_vm7, %v1654_v53, %v174_v47  ;;  %v343_v56 = vsel %vm2178_vm1, %v336_v50, %v338_v52  ;;  %v59_v47 = vmul.f32 0.055555556, %v52_v44  ;;  %v1762_v50 = vadd.s32 384, %v1566_v8 }
  0xb6   :  { %469 = vmatpush1.msra.mxu0 %v191_v55  ;;  %525 = vmatprep.subr.mxu1 %v343_v56  ;;  %v1766_v55 = vadd.s32 640, %v1566_v8  ;;  %v1769_v56 = vadd.s32 512, %v1566_v8 }
  0xb7   :  { %526 = vmatpush1.msra.mxu1 %v344_v57  ;;  %1303 = vmatmul.mubr.msk.f32.vlgmr.msra.gmra.mxu0 %vm2171_vm8, %v1659_v54  ;;  %v1309_v51 = vtrunc.f32 %v59_v47 }
  0xb8   :  { %v311_v58 = vpop.permute.xlu0 %310  ;;  %v313_v59 = vpop.permute.xlu1 %312  ;;  %644 = vmatprep.mubr.f32.mxu0 %v1410_v6 }
  0xb9   :  { %v318_v60 = vsel %vm2177_vm2, %v311_v58, %v313_v59  ;;  %v319_v61 = vsel %vm2177_vm2, %v1588_v20, %v311_v58  ;;  %v1310_v57 = vcvt.f32.s32 %v1309_v51 }
  0xba   :  { %527 = vmatprep.subr.mxu1 %v318_v60 }
  0xbb   :  { %528 = vmatpush1.msra.mxu1 %v319_v61  ;;  %v57_v61 = vcvt.s32.f32 %v1766_v55 }
  0xbc   :  { %v365_v62 = vpop.permute.xlu0 %364  ;;  %v286_v63 = vpop.permute.xlu1 %285 }
  0xbd   :  { %v367_v0 = vsel %vm2179_vm0, %v363_v43, %v365_v62  ;;  %v372_v1 = vsel %vm2179_vm0, %v365_v62, %v1568_v10  ;;  %v294_v10 = vsel %vm2176_vm3, %v1599_v25, %v286_v63  ;;  %v56_v62 = vcvt.s32.f32 %v1769_v56 }
  0xbe   :  { %594 = vmatprep.subr.mxu0 %v372_v1 }
  0xbf   :  { %595 = vmatpush1.msra.mxu0 %v367_v0 }
  0xc0   :  { %v288_v7 = vpop.permute.xlu0 %287  ;;  %v340_v9 = vpop.permute.xlu1 %339 }
  0xc1   :  { %v342_v11 = vsel %vm2178_vm1, %v338_v52, %v340_v9  ;;  %v293_v12 = vsel %vm2176_vm3, %v286_v63, %v288_v7  ;;  %v347_v13 = vsel %vm2178_vm1, %v340_v9, %v1579_v16  ;;  %v60_v52 = vmul.f32 0.055555556, %v53_v48 }
  0xc2   :  { %529 = vmatprep.subr.mxu1 %v293_v12  ;;  %596 = vmatprep.subr.mxu0 %v347_v13  ;;  %v83_v63 = vcvt.s32.f32 %v1310_v57  ;;  %v64_v9 = vmul.f32 0.055555556, %v57_v61 }
  0xc3   :  { %530 = vmatpush1.msra.mxu1 %v294_v10  ;;  %597 = vmatpush1.msra.mxu0 %v342_v11  ;;  %v1311_v58 = vtrunc.f32 %v60_v52  ;;  %v63_v11 = vmul.f32 0.055555556, %v56_v62 }
  0xc4   :  { %v315_v14 = vpop.permute.xlu0 %314  ;;  %v253_v15 = vpop.permute.xlu1 %252  ;;  %531 = vmatprep.subr.mxu1 %v1504_v4  ;;  %v89_v12 = vmul.f32 0.055555556, %v83_v63 }
  0xc5   :  { %v317_v17 = vsel %vm2177_vm2, %v313_v59, %v315_v14  ;;  %v322_v18 = vsel %vm2177_vm2, %v315_v14, %v1593_v22  ;;  %532 = vmatpush1.msra.mxu1 %v1464_v2  ;;  %v264_v2 = vsel %vm2175_vm4, %v1611_v30, %v253_v15  ;;  %v1312_v0 = vcvt.f32.s32 %v1311_v58 }
  0xc6   :  { %598 = vmatprep.subr.mxu0 %v322_v18  ;;  %v1321_v18 = vtrunc.f32 %v89_v12  ;;  %v2180_v58 = vmov 0 }
  0xc7   :  { %599 = vmatpush1.msra.mxu0 %v317_v17  ;;  %v84_v13 = vcvt.s32.f32 %v1312_v0  ;;  %v1317_v17 = vtrunc.f32 %v63_v11 }
  0xc8   :  { %v255_v16 = vpop.permute.xlu0 %254  ;;  %v290_v19 = vpop.permute.xlu1 %289 }
  0xc9   :  { %v292_v20 = vsel %vm2176_vm3, %v288_v7, %v290_v19  ;;  %v263_v21 = vsel %vm2175_vm4, %v253_v15, %v255_v16  ;;  %v297_v4 = vsel %vm2176_vm3, %v290_v19, %v1601_v26  ;;  %v1319_v15 = vtrunc.f32 %v64_v9 }
  0xca   :  { %533 = vmatprep.subr.mxu1 %v263_v21  ;;  %600 = vmatprep.subr.mxu0 %v297_v4  ;;  %v1775_v4 = vcvt.f32.s32 %v1317_v17 }
  0xcb   :  { %534 = vmatpush1.msra.mxu1 %v264_v2  ;;  %601 = vmatpush1.msra.mxu0 %v292_v20  ;;  %v1773_v21 = vcvt.f32.s32 %v1319_v15  ;;  %v1322_v2 = vcvt.f32.s32 %v1321_v18 }
  0xcc   :  { %v228_v22 = vpop.permute.xlu0 %227  ;;  %v230_v23 = vpop.permute.xlu1 %229  ;;  %602 = vmatprep.subr.mxu0 %v1490_v3 }
  0xcd   :  { %v238_v24 = vsel %vm2174_vm5, %v228_v22, %v230_v23  ;;  %v239_v25 = vsel %vm2174_vm5, %v1623_v35, %v228_v22  ;;  %603 = vmatpush1.msra.mxu0 %v1506_v5 }
  0xce   :  { %535 = vmatprep.subr.mxu1 %v238_v24 }
  0xcf   :  { %536 = vmatpush1.msra.mxu1 %v239_v25  ;;  %v88_v25 = vcvt.s32.f32 %v1773_v21 }
  0xd0   :  { %v203_v26 = vpop.permute.xlu0 %202  ;;  %v205_v27 = vpop.permute.xlu1 %204 }
  0xd1   :  { %v213_v28 = vsel %vm2173_vm6, %v203_v26, %v205_v27  ;;  %v214_v3 = vsel %vm2173_vm6, %v1634_v40, %v203_v26  ;;  %v87_v26 = vcvt.s32.f32 %v1775_v4 }
  0xd2   :  { %537 = vmatprep.subr.mxu1 %v213_v28 }
  0xd3   :  { %538 = vmatpush1.msra.mxu1 %v214_v3 }
  0xd4   :  { %v257_v29 = vpop.permute.xlu0 %256  ;;  %v178_v30 = vpop.permute.xlu1 %177 }
  0xd5   :  { %v262_v31 = vsel %vm2175_vm4, %v255_v16, %v257_v29  ;;  %v261_v5 = vsel %vm2175_vm4, %v257_v29, %v1617_v32  ;;  %v189_v32 = vsel %vm2172_vm7, %v1649_v49, %v178_v30  ;;  %v90_v16 = vmul.f32 0.055555556, %v84_v13 }
  0xd6   :  { %604 = vmatprep.subr.mxu0 %v261_v5  ;;  %v71_v5 = vmul.u32 18, %v1310_v57 }
  0xd7   :  { %605 = vmatpush1.msra.mxu0 %v262_v31  ;;  %v1323_v22 = vtrunc.f32 %v90_v16  ;;  %v93_v31 = vmul.f32 0.055555556, %v87_v26 }
  0xd8   :  { %v180_v33 = vpop.permute.xlu0 %179  ;;  %v232_v34 = vpop.permute.xlu1 %231 }
  0xd9   :  { %v237_v35 = vsel %vm2174_vm5, %v230_v23, %v232_v34  ;;  %v188_v37 = vsel %vm2172_vm7, %v178_v30, %v180_v33  ;;  %v236_v38 = vsel %vm2174_vm5, %v232_v34, %v1625_v36  ;;  %v1324_v28 = vcvt.f32.s32 %v1323_v22 }
  0xda   :  { %539 = vmatprep.subr.mxu1 %v188_v37  ;;  %606 = vmatprep.subr.mxu0 %v236_v38  ;;  %v94_v30 = vmul.f32 0.055555556, %v88_v25 }
  0xdb   :  { %540 = vmatpush1.msra.mxu1 %v189_v32  ;;  %607 = vmatpush1.msra.mxu0 %v237_v35  ;;  %v102_v34 = vmul.u32 18, %v1324_v28  ;;  %v1329_v32 = vtrunc.f32 %v93_v31 }
  0xdc   :  { %v207_v39 = vpop.permute.xlu0 %206  ;;  %1304 = vmatmul.mubr.msk.f32.vlgmr.msra.gmra.mxu1 %vm2171_vm8, %v1659_v54  ;;  %v182_v40 = vpop.permute.xlu1 %181  ;;  %v1331_v38 = vtrunc.f32 %v94_v30 }
  0xdd   :  { %v212_v41 = vsel %vm2173_vm6, %v205_v27, %v207_v39  ;;  %v211_v36 = vsel %vm2173_vm6, %v207_v39, %v1643_v46  ;;  %1052 = vmatprep.mubr.f32.mxu1 %v1410_v6  ;;  %v186_v42 = vsel %vm2172_vm7, %v182_v40, %v1654_v53  ;;  %v187_v43 = vsel %vm2172_vm7, %v180_v33, %v182_v40 }
  0xde   :  { %608 = vmatprep.subr.mxu0 %v211_v36  ;;  %v1757_v46 = vadd.s32 256, %v1566_v8  ;;  %v101_v27 = vmul.u32 18, %v1322_v2  ;;  %v77_v39 = vsub.s32 %v1566_v8, %v71_v5  ;;  %v72_v40 = vmul.u32 18, %v1312_v0 }
  0xdf   :  { %609 = vmatpush1.msra.mxu0 %v212_v41  ;;  %v108_v41 = vsub.s32 %v1312_v0, %v102_v34  ;;  %v1332_v44 = vcvt.f32.s32 %v1331_v38  ;;  %v1330_v47 = vcvt.f32.s32 %v1329_v32 }
  0xe0   :  { %610 = vmatprep.subr.mxu0 %v186_v42  ;;  %v54_v49 = vcvt.s32.f32 %v1757_v46  ;;  %v107_v33 = vsub.s32 %v1310_v57, %v101_v27  ;;  %vm131_vm12 = vcmp.ge.s32.totalorder %v77_v39, 1  ;;  %v78_v48 = vsub.s32 %v1754_v45, %v72_v40 }
  0xe1   :  { %611 = vmatpush1.msra.mxu0 %v187_v43  ;;  %vm114_vm13 = vcmp.ge.s32.totalorder %v108_v41, 1  ;;  %vm120_vm14 = vcmp.le.s32.totalorder %v108_v41, 16  ;;  %vm143_vm6 = vcmp.le.s32.totalorder %v77_v39, 16  ;;  %v76_v45 = vmul.u32 18, %v1773_v21 }
  0xe2   :  { %1305 = vmatmul.mubr.msk.f32.vlgmr.msra.gmra.mxu0 %vm2171_vm8, %v1659_v54  ;;  %v61_v53 = vmul.f32 0.055555556, %v54_v49  ;;  %v55_v54 = vcvt.s32.f32 %v1762_v50  ;;  %vm113_vm9 = vcmp.ge.s32.totalorder %v107_v33, 1  ;;  %vm119_vm10 = vcmp.le.s32.totalorder %v107_v33, 16  ;;  %vm126_vm5 = vmand %vm114_vm13, %vm120_vm14 }
  0xe3   :  { %1123 = vmatprep.mubr.f32.mxu0 %v1410_v6  ;;  %vm125_vm11 = vmand %vm113_vm9, %vm119_vm10  ;;  %vm132_vm4 = vcmp.ge.s32.totalorder %v78_v48, 1 }
  0xe4   :  { %v1313_v59 = vtrunc.f32 %v61_v53  ;;  %v62_v60 = vmul.f32 0.055555556, %v55_v54  ;;  %v106_v53 = vmul.u32 18, %v1332_v44  ;;  %vm137_vm7 = vmand %vm125_vm11, %vm131_vm12  ;;  %v105_v54 = vmul.u32 18, %v1330_v47 }
  0xe5   :  { %vm1784_vm9 = vmand %vm137_vm7, %vm143_vm6  ;;  %vm144_vm12 = vcmp.le.s32.totalorder %v78_v48, 16 }
  0xe6   :  { %v1314_v1 = vcvt.f32.s32 %v1313_v59  ;;  %v1315_v7 = vtrunc.f32 %v62_v60  ;;  %v2181_v58 = vsel %vm1784_vm9, 4294967295, %v2180_v58  ;;  %v112_v59 = vsub.s32 %v1773_v21, %v106_v53  ;;  %vm138_vm11 = vmand %vm126_vm5, %vm132_vm4 }
  0xe7   :  { %v111_v60 = vsub.s32 %v1775_v4, %v105_v54  ;;  %vm150_vm6 = vmand %vm138_vm11, %vm144_vm12  ;;  %v691_v54 = vld [vmem:[%s2165_s2] sm:$0xff] }
  0xe8   :  { %v85_v10 = vcvt.s32.f32 %v1314_v1  ;;  %v1316_v14 = vcvt.f32.s32 %v1315_v7  ;;  %v73_v36 = vmul.u32 18, %v1314_v1  ;;  %vm118_vm7 = vcmp.ge.s32.totalorder %v112_v59, 1 }
  0xe9   :  { %vm124_vm0 = vcmp.le.s32.totalorder %v112_v59, 16  ;;  %vm117_vm4 = vcmp.ge.s32.totalorder %v111_v60, 1  ;;  %vm123_vm5 = vcmp.le.s32.totalorder %v111_v60, 16 }
  0xea   :  { %v91_v19 = vmul.f32 0.055555556, %v85_v10  ;;  %v86_v20 = vcvt.s32.f32 %v1316_v14  ;;  %v79_v49 = vsub.s32 %v1757_v46, %v73_v36  ;;  %v74_v51 = vmul.u32 18, %v1316_v14  ;;  %vm129_vm12 = vmand %vm117_vm4, %vm123_vm5 }
  0xeb   :  { %v75_v46 = vmul.u32 18, %v1775_v4  ;;  %vm2185_vm5 = vcmp.lt.s32.totalorder %v1566_v8, 109 }
  0xec   :  { %v1325_v23 = vtrunc.f32 %v91_v19  ;;  %v92_v24 = vmul.f32 0.055555556, %v86_v20  ;;  %vm133_vm2 = vcmp.ge.s32.totalorder %v79_v49, 1  ;;  %v80_v57 = vsub.s32 %v1762_v50, %v74_v51 }
  0xed   :  { %vm145_vm13 = vcmp.le.s32.totalorder %v79_v49, 16  ;;  %v82_v50 = vsub.s32 %v1766_v55, %v76_v45  ;;  %v81_v62 = vsub.s32 %v1769_v56, %v75_v46  ;;  %v1411_v49 = vmov 0  }
  0xee   :  { %v1326_v3 = vcvt.f32.s32 %v1325_v23  ;;  %v1327_v29 = vtrunc.f32 %v92_v24  ;;  %1345 = vset.pattern.permute.xlu0 %v1411_v49  ;;  %1346 = vset.pattern.permute.xlu1 %v1411_v49 }
  0xef   :  { %vm136_vm11 = vcmp.ge.s32.totalorder %v82_v50, 1 }
  0xf0   :  { %v103_v35 = vmul.u32 18, %v1326_v3  ;;  %v1328_v37 = vcvt.f32.s32 %v1327_v29 }
  0xf2   :  { %v109_v42 = vsub.s32 %v1314_v1, %v103_v35  ;;  %v104_v43 = vmul.u32 18, %v1328_v37  ;;  %v1803_v1 = vsel %vm150_vm6, 1.0, %v1410_v6 }
  0xf4   :  { %vm115_vm15 = vcmp.ge.s32.totalorder %v109_v42, 1  ;;  %vm121_vm8 = vcmp.le.s32.totalorder %v109_v42, 16  ;;  %v110_v52 = vsub.s32 %v1316_v14, %v104_v43 }
  0xf5   :  { %vm127_vm3 = vmand %vm115_vm15, %vm121_vm8  ;;  %vm134_vm15 = vcmp.ge.s32.totalorder %v80_v57, 1 }
  0xf6   :  { %vm116_vm10 = vcmp.ge.s32.totalorder %v110_v52, 1  ;;  %vm122_vm1 = vcmp.le.s32.totalorder %v110_v52, 16  ;;  %vm139_vm8 = vmand %vm127_vm3, %vm133_vm2  ;;  %vm146_vm3 = vcmp.le.s32.totalorder %v80_v57, 16 }
  0xf7   :  { %vm128_vm14 = vmand %vm116_vm10, %vm122_vm1  ;;  %vm2184_vm1 = vnez %v2181_v58  ;;  %v695_v58 = vld [vmem:[%s2166_s3] sm:$0xff] }
  0xf8   :  { %vm1793_vm9 = vmand %vm139_vm8, %vm145_vm13  ;;  %v1800_v0 = vsel %vm2184_vm1, 1.0, %v1410_v6  ;;  %vm135_vm8 = vcmp.ge.s32.totalorder %v81_v62, 1  ;;  %vm147_vm1 = vcmp.le.s32.totalorder %v81_v62, 16 }
  0xf9   :  { %vm140_vm2 = vmand %vm128_vm14, %vm134_vm15  ;;  %vm148_vm15 = vcmp.le.s32.totalorder %v82_v50, 16  ;;  %v1814_v11 = vsel %vm1793_vm9, 1.0, %v1410_v6 }
  0xfa   :  { %vm130_vm10 = vmand %vm118_vm7, %vm124_vm0  ;;  %vm160_vm7 = vcmp.lt.s32.totalorder %v1766_v55, 648 }
  0xfb   :  { %vm152_vm13 = vmand %vm140_vm2, %vm146_vm3  ;;  %vm2187_vm3 = vcmp.lt.s32.totalorder %v1566_v8, 110 }
  0xfc   :  { %vm142_vm14 = vmand %vm130_vm10, %vm136_vm11  ;;  %v1817_v13 = vsel %vm152_vm13, 1.0, %v1410_v6  ;;  %vm2189_vm11 = vcmp.lt.s32.totalorder %v1566_v8, 111 }
  0xfd   :  { %vm141_vm6 = vmand %vm129_vm12, %vm135_vm8  ;;  %vm2191_vm8 = vcmp.lt.s32.totalorder %v1566_v8, 127 }
  0xfe   :  { %vm154_vm0 = vmand %vm142_vm14, %vm148_vm15  ;;  %vm2193_vm14 = vcmp.lt.s32.totalorder %v1566_v8, 1 }
  0xff   :  { %vm153_vm4 = vmand %vm141_vm6, %vm147_vm1  ;;  %vm2195_vm6 = vcmp.lt.s32.totalorder %v1566_v8, 17 }
 0x100   :  { %vm166_vm9 = vmand %vm154_vm0, %vm160_vm7  ;;  %v1827_v16 = vsel %vm153_vm4, 1.0, %v1410_v6  ;;  %vm2197_vm0 = vcmp.lt.s32.totalorder %v1566_v8, 18 }
 0x101   :  { %v1830_v20 = vsel %vm166_vm9, 1.0, %v1410_v6  ;;  %vm2186_vm2 = vmmov %vm2185_vm5 }
 0x102   :  { %vm2188_vm10 = vmmov %vm2187_vm3 }
 0x103   :  { %vm2190_vm12 = vmmov %vm2189_vm11 }
 0x104   :  { %vm2192_vm13 = vmmov %vm2191_vm8 }
 0x105   :  { %vm2194_vm15 = vmmov %vm2193_vm14 }
 0x106   :  { %vm2196_vm1 = vmmov %vm2195_vm6 }
 0x107   :  { %vm2198_vm7 = vmmov %vm2197_vm0 }
 0x108   :  { %vm2199_vm4 = vmmov %vm2186_vm2 }
 0x109   :  { %vm2200_vm9 = vmmov %vm2186_vm2 }
 0x177   :  { %v504_v61 = vpop.f32.mrf.mxu0 }
 0x178   :  { %v1806_v56 = vmul.f32 %v504_v61, %v1800_v0 }
 0x179   :  { %v506_v7 = vpop.f32.mrf.mxu0 }
 0x17a   :  { %v1809_v9 = vmul.f32 %v506_v7, %v1803_v1 }
 0x17c   :  { %v657_v10 = vadd.f32 %v1809_v9, %v1806_v56 }
 0x19c   :  { %v575_v12 = vpop.f32.mrf.mxu1 }
 0x19d   :  { %v653_v14 = vmul.f32 %v575_v12, %v1814_v11 }
 0x19e   :  { %v577_v15 = vpop.f32.mrf.mxu1 }
 0x19f   :  { %v658_v17 = vadd.f32 %v657_v10, %v653_v14  ;;  %v1824_v18 = vmul.f32 %v577_v15, %v1817_v13 }
 0x1a1   :  { %v659_v55 = vadd.f32 %v658_v17, %v1824_v18 }
 0x1a2   :  { %v646_v19 = vpop.f32.mrf.mxu0 }
 0x1a3   :  { %v1834_v21 = vmul.f32 %v646_v19, %v1827_v16 }
 0x1a4   :  { %v648_v4 = vpop.f32.mrf.mxu0 }
 0x1a5   :  { %v656_v2 = vmul.f32 %v648_v4, %v1830_v20  ;;  %v660_v22 = vadd.f32 %v659_v55, %v1834_v21 }
 0x1a7   :  { %v661_v23 = vadd.f32 %v660_v22, %v656_v2 }
 0x1a9   :  { %662 = vadd.xlane.f32.xlu0 %v661_v23 }
 0x232   :  { %v663_v24 = vpop.xlane.xlu0 %662 }
 0x233   :  { %v664_v25 = vmul.f32 0.001953125, %v663_v24 }
 0x235   :  { %v665_v26 = vsub.f32 %v1806_v56, %v664_v25  ;;  %v666_v27 = vsub.f32 %v1809_v9, %v664_v25  ;;  %v667_v28 = vsub.f32 %v653_v14, %v664_v25  ;;  %v668_v3 = vsub.f32 %v1824_v18, %v664_v25 }
 0x236   :  { %v669_v29 = vsub.f32 %v1834_v21, %v664_v25  ;;  %v670_v33 = vsub.f32 %v656_v2, %v664_v25 }
 0x237   :  { %v671_v30 = vmul.f32 %v665_v26, %v1800_v0  ;;  %v672_v31 = vmul.f32 %v666_v27, %v1803_v1  ;;  %v673_v5 = vmul.f32 %v667_v28, %v1814_v11  ;;  %v674_v34 = vmul.f32 %v668_v3, %v1817_v13 }
 0x238   :  { %v675_v38 = vmul.f32 %v669_v29, %v1827_v16  ;;  %v676_v40 = vmul.f32 %v670_v33, %v1830_v20 }
 0x239   :  { %v677_v35 = vmul.f32 %v671_v30, %v671_v30  ;;  %v678_v37 = vmul.f32 %v672_v31, %v672_v31  ;;  %v679_v32 = vmul.f32 %v673_v5, %v673_v5  ;;  %v680_v41 = vmul.f32 %v674_v34, %v674_v34 }
 0x23a   :  { %v681_v42 = vmul.f32 %v675_v38, %v675_v38  ;;  %v682_v44 = vmul.f32 %v676_v40, %v676_v40 }
 0x23b   :  { %v683_v39 = vadd.f32 %v678_v37, %v677_v35 }
 0x23d   :  { %v684_v36 = vadd.f32 %v683_v39, %v679_v32 }
 0x23f   :  { %v685_v43 = vadd.f32 %v684_v36, %v680_v41 }
 0x241   :  { %v686_v47 = vadd.f32 %v685_v43, %v681_v42 }
 0x243   :  { %v687_v48 = vadd.f32 %v686_v47, %v682_v44 }
 0x245   :  { %688 = vadd.xlane.f32.xlu1 %v687_v48 }
 0x2ce   :  { %v689_v51 = vpop.xlane.xlu1 %688 }
 0x2cf   :  { %v690_v52 = vmul.f32 0.001953125, %v689_v51 }
 0x2d1   :  { %v692_v53 = vadd.f32 1e-05, %v690_v52 }
 0x2d3   :  { %1347 = vrsqrt.f32 %v692_v53 }
 0x2e0   :  { %v1348_v57 = vpop.eup %1347 }
 0x2e1   :  { %v694_v45 = vmul.f32 %v1348_v57, %v691_v54 }
 0x2e3   :  { %700 = vperm.xlu0 %1345, %v694_v45   ;;  %v696_v46 = vmul.f32 %v694_v45, %v664_v25 }
 0x2e5   :  { %v697_v59 = vsub.f32 %v695_v58, %v696_v46 }
 0x2e7   :  { %711 = vperm.xlu1 %1346, %v697_v59  }
 0x35e   :  { %v701_v60 = vpop.permute.xlu0 %700 }
 0x35f   :  { %v703_v61 = vmul.f32 %v701_v60, %v1806_v56  ;;  %v704_v50 = vmul.f32 %v701_v60, %v1809_v9  ;;  %v705_v62 = vmul.f32 %v701_v60, %v653_v14  ;;  %v708_v14 = vmul.f32 %v701_v60, %v656_v2 }
 0x360   :  { %v706_v23 = vmul.f32 %v701_v60, %v1824_v18  ;;  %v707_v26 = vmul.f32 %v701_v60, %v1834_v21 }
 0x362   :  { %v712_v63 = vpop.permute.xlu1 %711 }
 0x363   :  { %v714_v7 = vadd.f32 %v712_v63, %v703_v61  ;;  %v715_v12 = vadd.f32 %v712_v63, %v704_v50  ;;  %v716_v10 = vadd.f32 %v712_v63, %v705_v62  ;;  %v719_v4 = vadd.f32 %v712_v63, %v708_v14 }
 0x364   :  { %v717_v24 = vadd.f32 %v712_v63, %v706_v23  ;;  %v718_v27 = vadd.f32 %v712_v63, %v707_v26 }
 0x365   :  { %v721_v15 = vmax.f32 %v715_v12, 0.0  ;;  %v720_v17 = vmax.f32 %v714_v7, 0.0  ;;  %v722_v19 = vmax.f32 %v716_v10, 0.0  ;;  %v725_v22 = vmax.f32 %v719_v4, 0.0 }
 0x366   :  { %v723_v25 = vmax.f32 %v717_v24, 0.0  ;;  %v724_v28 = vmax.f32 %v718_v27, 0.0 }
 0x367   :  { %v1857_v55 = vmul.f32 %v721_v15, %v1803_v1  ;;  %v1864_v56 = vmul.f32 %v720_v17, %v1800_v0  ;;  %v1867_v9 = vmul.f32 %v722_v19, %v1814_v11  ;;  %v1882_v2 = vmul.f32 %v725_v22, %v1830_v20 }
 0x368   :  { %v1898_v18 = vmul.f32 %v723_v25, %v1817_v13  ;;  %v1914_v21 = vmul.f32 %v724_v28, %v1827_v16  ;;  %v2056_v28 = vld [vmem:[%s2167_s4] sm:$0xff] }
 0x369   :  { %860 = vrot.lane.b32.xlu0 %v1857_v55, %s1404_s0  ;;  %908 = vrot.lane.b32.xlu1 %v1857_v55, %s1402_s29 }
 0x36d   :  { %910 = vrot.lane.b32.xlu1 %v1867_v9, %s1402_s29  ;;  %858 = vrot.lane.b32.xlu0 %v1864_v56, %s1404_s0 }
 0x371   :  { %838 = vrot.lane.b32.xlu0 %v1867_v9, %s1405_s8  ;;  %906 = vrot.lane.b32.xlu1 %v1864_v56, %s1402_s29 }
 0x375   :  { %804 = vrot.lane.b32.xlu0 %v1864_v56, %s1406_s9  ;;  %884 = vrot.lane.b32.xlu1 %v1857_v55, %s1403_s30 }
 0x379   :  { %814 = vrot.lane.b32.xlu0 %v1882_v2, %s1406_s9  ;;  %886 = vrot.lane.b32.xlu1 %v1867_v9, %s1403_s30 }
 0x37d   :  { %782 = vrot.lane.b32.xlu0 %v1857_v55, %s1407_s10  ;;  %882 = vrot.lane.b32.xlu1 %v1864_v56, %s1403_s30 }
 0x381   :  { %756 = vrot.lane.b32.xlu0 %v1864_v56, %s1408_s11  ;;  %862 = vrot.lane.b32.xlu1 %v1867_v9, %s1404_s0 }
 0x385   :  { %912 = vrot.lane.b32.xlu0 %v1898_v18, %s1402_s29  ;;  %836 = vrot.lane.b32.xlu1 %v1857_v55, %s1405_s8 }
 0x389   :  { %766 = vrot.lane.b32.xlu0 %v1882_v2, %s1408_s11  ;;  %834 = vrot.lane.b32.xlu1 %v1864_v56, %s1405_s8 }
 0x38d   :  { %734 = vrot.lane.b32.xlu0 %v1857_v55, %s1409_s12  ;;  %806 = vrot.lane.b32.xlu1 %v1857_v55, %s1406_s9 }
 0x391   :  { %890 = vrot.lane.b32.xlu0 %v1914_v21, %s1403_s30  ;;  %780 = vrot.lane.b32.xlu1 %v1864_v56, %s1407_s10 }
 0x395   :  { %864 = vrot.lane.b32.xlu0 %v1898_v18, %s1404_s0  ;;  %790 = vrot.lane.b32.xlu1 %v1882_v2, %s1407_s10 }
 0x399   :  { %916 = vrot.lane.b32.xlu0 %v1882_v2, %s1402_s29  ;;  %758 = vrot.lane.b32.xlu1 %v1857_v55, %s1408_s11 }
 0x39d   :  { %842 = vrot.lane.b32.xlu0 %v1914_v21, %s1405_s8  ;;  %914 = vrot.lane.b32.xlu1 %v1914_v21, %s1402_s29 }
 0x3a1   :  { %868 = vrot.lane.b32.xlu0 %v1882_v2, %s1404_s0  ;;  %732 = vrot.lane.b32.xlu1 %v1864_v56, %s1409_s12 }
 0x3a5   :  { %810 = vrot.lane.b32.xlu0 %v1898_v18, %s1406_s9  ;;  %888 = vrot.lane.b32.xlu1 %v1898_v18, %s1403_s30 }
 0x3a9   :  { %784 = vrot.lane.b32.xlu0 %v1867_v9, %s1407_s10  ;;  %742 = vrot.lane.b32.xlu1 %v1882_v2, %s1409_s12 }
 0x3ad   :  { %760 = vrot.lane.b32.xlu0 %v1867_v9, %s1408_s11  ;;  %866 = vrot.lane.b32.xlu1 %v1914_v21, %s1404_s0 }
 0x3b1   :  { %812 = vrot.lane.b32.xlu0 %v1914_v21, %s1406_s9  ;;  %840 = vrot.lane.b32.xlu1 %v1898_v18, %s1405_s8 }
 0x3b5   :  { %738 = vrot.lane.b32.xlu0 %v1898_v18, %s1409_s12  ;;  %892 = vrot.lane.b32.xlu1 %v1882_v2, %s1403_s30 }
 0x3b9   :  { %764 = vrot.lane.b32.xlu0 %v1914_v21, %s1408_s11  ;;  %808 = vrot.lane.b32.xlu1 %v1867_v9, %s1406_s9 }
 0x3bd   :  { %844 = vrot.lane.b32.xlu1 %v1882_v2, %s1405_s8 }
 0x3c1   :  { %786 = vrot.lane.b32.xlu1 %v1898_v18, %s1407_s10 }
 0x3c5   :  { %762 = vrot.lane.b32.xlu1 %v1898_v18, %s1408_s11 }
 0x3c9   :  { %736 = vrot.lane.b32.xlu1 %v1867_v9, %s1409_s12 }
 0x3cd   :  { %788 = vrot.lane.b32.xlu1 %v1914_v21, %s1407_s10 }
 0x3d1   :  { %740 = vrot.lane.b32.xlu1 %v1914_v21, %s1409_s12 }
 0x3db   :  { %v861_v3 = vpop.permute.xlu0 %860  ;;  %v909_v29 = vpop.permute.xlu1 %908 }
 0x3df   :  { %v911_v30 = vpop.permute.xlu1 %910  ;;  %v1972_v31 = vpop.permute.xlu0 %858 }
 0x3e0   :  { %v921_v5 = vsel %vm2185_vm5, %v909_v29, %v911_v30  ;;  %v874_v48 = vsel %vm2190_vm12, %v1972_v31, %v861_v3  ;;  %vm2201_vm5 = vcmp.lt.s32.totalorder %v1566_v8, 19  ;;  %vm2206_vm12 = vmmov %vm2199_vm4 }
 0x3e1   :  { %1002 = vmatprep.subr.mxu1 %v921_v5 }
 0x3e3   :  { %v1976_v33 = vpop.permute.xlu0 %838  ;;  %v1978_v34 = vpop.permute.xlu1 %906 }
 0x3e4   :  { %v922_v35 = vsel %vm2186_vm2, %v1978_v34, %v909_v29  ;;  %vm2202_vm2 = vmmov %vm2187_vm3 }
 0x3e5   :  { %1003 = vmatpush1.msra.mxu1 %v922_v35 }
 0x3e7   :  { %v805_v37 = vpop.permute.xlu0 %804  ;;  %v885_v38 = vpop.permute.xlu1 %884 }
 0x3eb   :  { %v1983_v32 = vpop.permute.xlu0 %814  ;;  %v887_v39 = vpop.permute.xlu1 %886 }
 0x3ec   :  { %v897_v40 = vsel %vm2187_vm3, %v885_v38, %v887_v39  ;;  %v821_v59 = vsel %vm2194_vm15, %v1983_v32, %v805_v37  ;;  %vm2203_vm3 = vmmov %vm2202_vm2  ;;  %vm2210_vm15 = vcmp.lt.s32.totalorder %v1566_v8, 127 }
 0x3ed   :  { %1004 = vmatprep.subr.mxu1 %v897_v40 }
 0x3ef   :  { %v1987_v41 = vpop.permute.xlu0 %782  ;;  %v1989_v36 = vpop.permute.xlu1 %882 }
 0x3f0   :  { %v898_v42 = vsel %vm2188_vm10, %v1989_v36, %v885_v38  ;;  %vm2204_vm10 = vmmov %vm2201_vm5 }
 0x3f1   :  { %1005 = vmatpush1.msra.mxu1 %v898_v42 }
 0x3f3   :  { %v757_v43 = vpop.permute.xlu0 %756  ;;  %v1994_v44 = vpop.permute.xlu1 %862 }
 0x3f4   :  { %v873_v47 = vsel %vm2189_vm11, %v861_v3, %v1994_v44  ;;  %vm2205_vm11 = vmmov %vm2199_vm4 }
 0x3f5   :  { %1006 = vmatprep.subr.mxu1 %v873_v47 }
 0x3f6   :  { %1007 = vmatpush1.msra.mxu1 %v874_v48 }
 0x3f7   :  { %v913_v49 = vpop.permute.xlu0 %912  ;;  %v837_v51 = vpop.permute.xlu1 %836 }
 0x3f8   :  { %v849_v52 = vsel %vm2191_vm8, %v837_v51, %v1976_v33  ;;  %vm2207_vm8 = vcmask 588800  }
 0x3f9   :  { %1008 = vmatprep.subr.mxu1 %v849_v52 }
 0x3fb   :  { %v2005_v53 = vpop.permute.xlu0 %766  ;;  %v2007_v54 = vpop.permute.xlu1 %834 }
 0x3fc   :  { %v850_v57 = vsel %vm2192_vm13, %v2007_v54, %v837_v51  ;;  %v773_v15 = vsel %vm2198_vm7, %v2005_v53, %v757_v43  ;;  %vm2208_vm13 = vcmp.lt.s32.totalorder %v1566_v8, 111 }
 0x3fd   :  { %1009 = vmatpush1.msra.mxu1 %v850_v57  ;;  %vm2214_vm7 = vmmov %vm2208_vm13 }
 0x3fe   :  { %1010 = vmatprep.subr.mxu1 %v1857_v55 }
 0x3ff   :  { %v2013_v45 = vpop.permute.xlu0 %734  ;;  %1011 = vmatpush1.msra.mxu1 %v1864_v56  ;;  %v2016_v58 = vpop.permute.xlu1 %806  ;;  %v920_v56 = vsel %vm2200_vm9, %v911_v30, %v913_v49  ;;  %vm2216_vm9 = vcmp.lt.s32.totalorder %v1566_v8, 1 }
 0x400   :  { %v820_v46 = vsel %vm2193_vm14, %v805_v37, %v2016_v58  ;;  %vm2209_vm14 = vmmov %vm2208_vm13 }
 0x401   :  { %1012 = vmatprep.subr.mxu1 %v820_v46 }
 0x402   :  { %1013 = vmatpush1.msra.mxu1 %v821_v59 }
 0x403   :  { %v891_v60 = vpop.permute.xlu0 %890  ;;  %v781_v61 = vpop.permute.xlu1 %780 }
 0x404   :  { %v796_v50 = vsel %vm2195_vm6, %v781_v61, %v1987_v41  ;;  %vm2211_vm6 = vmmov %vm2210_vm15 }
 0x405   :  { %1014 = vmatprep.subr.mxu1 %v796_v50 }
 0x407   :  { %v865_v62 = vpop.permute.xlu0 %864  ;;  %v2027_v63 = vpop.permute.xlu1 %790 }
 0x408   :  { %v797_v7 = vsel %vm2196_vm1, %v2027_v63, %v781_v61  ;;  %v872_v38 = vsel %vm2209_vm14, %v1994_v44, %v865_v62  ;;  %vm2212_vm1 = vmmov %vm2202_vm2 }
 0x409   :  { %1015 = vmatpush1.msra.mxu1 %v797_v7 }
 0x40b   :  { %v2032_v12 = vpop.permute.xlu1 %758  ;;  %v917_v17 = vpop.permute.xlu0 %916 }
 0x40c   :  { %v772_v10 = vsel %vm2197_vm0, %v757_v43, %v2032_v12  ;;  %v923_v29 = vsel %vm2205_vm11, %v917_v17, %v1978_v34  ;;  %vm2213_vm0 = vmmov %vm2212_vm1 }
 0x40d   :  { %1016 = vmatprep.subr.mxu1 %v772_v10 }
 0x40e   :  { %1017 = vmatpush1.msra.mxu1 %v773_v15 }
 0x40f   :  { %v915_v19 = vpop.permute.xlu1 %914  ;;  %v843_v14 = vpop.permute.xlu0 %842 }
 0x410   :  { %v919_v55 = vsel %vm2199_vm4, %v913_v49, %v915_v19  ;;  %v918_v30 = vsel %vm2206_vm12, %v915_v19, %v917_v17  ;;  %vm2215_vm4 = vmmov %vm2214_vm7 }
 0x411   :  { %1073 = vmatprep.subr.mxu0 %v919_v55 }
 0x412   :  { %1074 = vmatpush1.msra.mxu0 %v920_v56 }
 0x413   :  { %v733_v4 = vpop.permute.xlu1 %732  ;;  %v869_v26 = vpop.permute.xlu0 %868 }
 0x414   :  { %v748_v22 = vsel %vm2201_vm5, %v733_v4, %v2013_v45  ;;  %vm2217_vm5 = vmmov %vm2216_vm9 }
 0x415   :  { %1018 = vmatprep.subr.mxu1 %v748_v22  ;;  %vm2221_vm11 = vmmov %vm2217_vm5 }
 0x417   :  { %v889_v23 = vpop.permute.xlu1 %888  ;;  %v811_v5 = vpop.permute.xlu0 %810 }
 0x418   :  { %v896_v24 = vsel %vm2202_vm2, %v887_v39, %v889_v23  ;;  %v895_v25 = vsel %vm2203_vm3, %v889_v23, %v891_v60  ;;  %vm2218_vm2 = vmmov %vm2211_vm6 }
 0x419   :  { %1075 = vmatprep.subr.mxu0 %v895_v25  ;;  %vm2219_vm3 = vmmov %vm2218_vm2 }
 0x41a   :  { %1076 = vmatpush1.msra.mxu0 %v896_v24 }
 0x41b   :  { %v2051_v27 = vpop.permute.xlu1 %742  ;;  %v785_v42 = vpop.permute.xlu0 %784 }
 0x41c   :  { %v749_v3 = vsel %vm2204_vm10, %v2051_v27, %v733_v4  ;;  %vm2220_vm10 = vcmp.lt.s32.totalorder %v1566_v8, 17 }
 0x41d   :  { %1019 = vmatpush1.msra.mxu1 %v749_v3  ;;  %vm2222_vm12 = vmmov %vm2220_vm10 }
 0x41e   :  { %1144 = vmatprep.subr.mxu1 %v923_v29  ;;  %1306 = vmatmul.mubr.msk.f32.vlgmr.msra.gmra.mxu1 %vm2207_vm8, %v2056_v28  ;;  %v795_v59 = vsel %vm2222_vm12, %v1987_v41, %v785_v42  ;;  %vm2223_vm8 = vmmov %vm2217_vm5 }
 0x41f   :  { %1145 = vmatpush1.msra.mxu1 %v918_v30  ;;  %v867_v35 = vpop.permute.xlu1 %866  ;;  %1194 = vmatprep.mubr.f32.mxu1 %v1410_v6  ;;  %v761_v47 = vpop.permute.xlu0 %760 }
 0x420   :  { %v871_v37 = vsel %vm2208_vm13, %v865_v62, %v867_v35  ;;  %vm2224_vm13 = vcmp.lt.s32.totalorder %v1566_v8, 18 }
 0x421   :  { %1077 = vmatprep.subr.mxu0 %v871_v37  ;;  %vm2225_vm14 = vmmov %vm2224_vm13 }
 0x422   :  { %1078 = vmatpush1.msra.mxu0 %v872_v38 }
 0x423   :  { %v841_v34 = vpop.permute.xlu1 %840  ;;  %v813_v52 = vpop.permute.xlu0 %812 }
 0x424   :  { %v848_v39 = vsel %vm2210_vm15, %v1976_v33, %v841_v34  ;;  %v847_v40 = vsel %vm2211_vm6, %v841_v34, %v843_v14  ;;  %v875_v33 = vsel %vm2214_vm7, %v869_v26, %v1972_v31  ;;  %v816_v46 = vsel %vm2221_vm11, %v813_v52, %v1983_v32 }
 0x425   :  { %1079 = vmatprep.subr.mxu0 %v847_v40  ;;  %vm2226_vm15 = vcmp.lt.s32.totalorder %v1566_v8, 19 }
 0x426   :  { %1080 = vmatpush1.msra.mxu0 %v848_v39  ;;  %vm2227_vm6 = vmmov %vm2226_vm15 }
 0x427   :  { %1081 = vmatprep.subr.mxu0 %v1898_v18  ;;  %v893_v6 = vpop.permute.xlu1 %892  ;;  %v870_v18 = vsel %vm2215_vm4, %v867_v35, %v869_v26  ;;  %v739_v32 = vpop.permute.xlu0 %738  ;;  %vm2231_vm4 = vmmov %vm2224_vm13 }
 0x428   :  { %v894_v43 = vsel %vm2212_vm1, %v891_v60, %v893_v6  ;;  %1082 = vmatpush1.msra.mxu0 %v1867_v9  ;;  %v899_v44 = vsel %vm2213_vm0, %v893_v6, %v1989_v36  ;;  %v771_v60 = vsel %vm2225_vm14, %v2032_v12, %v761_v47  ;;  %vm2228_vm1 = vcmask 588800   ;;  %vm2229_vm0 = vmmov %vm2220_vm10 }
 0x429   :  { %1146 = vmatprep.subr.mxu1 %v899_v44  ;;  %vm2230_vm7 = vmmov %vm2229_vm0 }
 0x42a   :  { %1147 = vmatpush1.msra.mxu1 %v894_v43 }
 0x42b   :  { %1148 = vmatprep.subr.mxu1 %v875_v33  ;;  %v809_v48 = vpop.permute.xlu1 %808  ;;  %v765_v62 = vpop.permute.xlu0 %764 }
 0x42c   :  { %v819_v9 = vsel %vm2216_vm9, %v2016_v58, %v809_v48  ;;  %1149 = vmatpush1.msra.mxu1 %v870_v18  ;;  %v818_v36 = vsel %vm2217_vm5, %v809_v48, %v811_v5  ;;  %vm2232_vm9 = vmmov %vm2231_vm4 }
 0x42d   :  { %1083 = vmatprep.subr.mxu0 %v818_v36  ;;  %vm2233_vm5 = vmmov %vm2227_vm6 }
 0x42e   :  { %1084 = vmatpush1.msra.mxu0 %v819_v9 }
 0x42f   :  { %v845_v49 = vpop.permute.xlu1 %844 }
 0x430   :  { %v846_v31 = vsel %vm2218_vm2, %v843_v14, %v845_v49  ;;  %v851_v51 = vsel %vm2219_vm3, %v845_v49, %v2007_v54  ;;  %v817_v54 = vsel %vm2223_vm8, %v811_v5, %v813_v52  ;;  %vm2234_vm2 = vmmov %vm2233_vm5 }
 0x431   :  { %1150 = vmatprep.subr.mxu1 %v851_v51  ;;  %vm2235_vm3 = vmmov %vm2228_vm1 }
 0x432   :  { %1151 = vmatpush1.msra.mxu1 %v846_v31 }
 0x433   :  { %1152 = vmatprep.subr.mxu1 %v1882_v2  ;;  %v787_v57 = vpop.permute.xlu1 %786 }
 0x434   :  { %1153 = vmatpush1.msra.mxu1 %v1914_v21  ;;  %v794_v58 = vsel %vm2220_vm10, %v785_v42, %v787_v57 }
 0x435   :  { %1085 = vmatprep.subr.mxu0 %v794_v58  ;;  %1154 = vmatprep.subr.mxu1 %v816_v46 }
 0x436   :  { %1086 = vmatpush1.msra.mxu0 %v795_v59  ;;  %1155 = vmatpush1.msra.mxu1 %v817_v54 }
 0x437   :  { %v763_v2 = vpop.permute.xlu1 %762 }
 0x438   :  { %v770_v21 = vsel %vm2224_vm13, %v761_v47, %v763_v2  ;;  %v769_v15 = vsel %vm2232_vm9, %v763_v2, %v765_v62 }
 0x439   :  { %1087 = vmatprep.subr.mxu0 %v770_v21 }
 0x43a   :  { %1088 = vmatpush1.msra.mxu0 %v771_v60 }
 0x43b   :  { %v737_v61 = vpop.permute.xlu1 %736 }
 0x43c   :  { %v747_v41 = vsel %vm2226_vm15, %v2013_v45, %v737_v61  ;;  %v746_v50 = vsel %vm2227_vm6, %v737_v61, %v739_v32  ;;  %v768_v45 = vsel %vm2231_vm4, %v765_v62, %v2005_v53 }
 0x43d   :  { %1089 = vmatprep.subr.mxu0 %v746_v50 }
 0x43e   :  { %1090 = vmatpush1.msra.mxu0 %v747_v41 }
 0x43f   :  { %1307 = vmatmul.mubr.msk.f32.vlgmr.msra.gmra.mxu0 %vm2228_vm1, %v2056_v28  ;;  %v789_v7 = vpop.permute.xlu1 %788 }
 0x440   :  { %v793_v12 = vsel %vm2229_vm0, %v787_v57, %v789_v7  ;;  %v792_v10 = vsel %vm2230_vm7, %v789_v7, %v2027_v63 }
 0x441   :  { %1156 = vmatprep.subr.mxu1 %v792_v10 }
 0x442   :  { %1157 = vmatpush1.msra.mxu1 %v793_v12 }
 0x443   :  { %1158 = vmatprep.subr.mxu1 %v768_v45  ;;  %v741_v17 = vpop.permute.xlu1 %740 }
 0x444   :  { %v745_v19 = vsel %vm2233_vm5, %v739_v32, %v741_v17  ;;  %1159 = vmatpush1.msra.mxu1 %v769_v15  ;;  %v744_v55 = vsel %vm2234_vm2, %v741_v17, %v2051_v27 }
 0x445   :  { %1160 = vmatprep.subr.mxu1 %v744_v55 }
 0x446   :  { %1161 = vmatpush1.msra.mxu1 %v745_v19 }
 0x447   :  { %1308 = vmatmul.mubr.msk.f32.vlgmr.msra.gmra.mxu1 %vm2235_vm3, %v2056_v28 }
 0x4de   :  { %v1054_v63 = vpop.f32.mrf.mxu1 }
 0x4df   :  { %v1201_v56 = vmul.f32 %v1054_v63, %v1800_v0 }
 0x4e0   :  { %v1056_v53 = vpop.f32.mrf.mxu1 }
 0x4e1   :  { %v1202_v14 = vmul.f32 %v1056_v53, %v1803_v1  ;;  %v1351_v53 = vld [vmem:[#allocation3] sm:$0xff] }
 0x4e3   :  { %v1207_v24 = vadd.f32 %v1202_v14, %v1201_v56 }
 0x4ff   :  { %v1125_v4 = vpop.f32.mrf.mxu0 }
 0x500   :  { %v1203_v22 = vmul.f32 %v1125_v4, %v1814_v11 }
 0x501   :  { %v1127_v23 = vpop.f32.mrf.mxu0 }
 0x502   :  { %v1208_v25 = vadd.f32 %v1207_v24, %v1203_v22  ;;  %v1204_v8 = vmul.f32 %v1127_v23, %v1817_v13  ;;  %v1352_v23 = vld [vmem:[#allocation3 + $0x8] sm:$0xff] }
 0x504   :  { %v1209_v27 = vadd.f32 %v1208_v25, %v1204_v8  ;;  %v1353_v25 = vld [vmem:[#allocation3 + $0x10] sm:$0xff] }
 0x507   :  { %v1196_v26 = vpop.f32.mrf.mxu1 }
 0x508   :  { %v1205_v3 = vmul.f32 %v1196_v26, %v1827_v16 }
 0x509   :  { %v1198_v29 = vpop.f32.mrf.mxu1 }
 0x50a   :  { %v1206_v28 = vmul.f32 %v1198_v29, %v1830_v20  ;;  %v1210_v30 = vadd.f32 %v1209_v27, %v1205_v3  ;;  %v1354_v27 = vld [vmem:[#allocation3 + $0x18] sm:$0xff] }
 0x50c   :  { %v1211_v5 = vadd.f32 %v1210_v30, %v1206_v28 }
 0x50e   :  { %1212 = vadd.xlane.f32.xlu0 %v1211_v5 }
 0x597   :  { %v1213_v35 = vpop.xlane.xlu0 %1212 }
 0x598   :  { %v1214_v37 = vmul.f32 0.001953125, %v1213_v35 }
 0x59a   :  { %v1215_v38 = vsub.f32 %v1201_v56, %v1214_v37  ;;  %v1216_v34 = vsub.f32 %v1202_v14, %v1214_v37  ;;  %v1217_v39 = vsub.f32 %v1203_v22, %v1214_v37  ;;  %v1218_v40 = vsub.f32 %v1204_v8, %v1214_v37 }
 0x59b   :  { %v1219_v42 = vsub.f32 %v1205_v3, %v1214_v37  ;;  %v1220_v33 = vsub.f32 %v1206_v28, %v1214_v37 }
 0x59c   :  { %v1221_v6 = vmul.f32 %v1215_v38, %v1800_v0  ;;  %v1222_v43 = vmul.f32 %v1216_v34, %v1803_v1  ;;  %v1223_v44 = vmul.f32 %v1217_v39, %v1814_v11  ;;  %v1224_v47 = vmul.f32 %v1218_v40, %v1817_v13  ;;  %v1241_v13 = vld [vmem:[%s2168_s5] sm:$0xff]  ;;  %s1412_s5 = smov [#allocation6]  }
 0x59d   :  { %v1225_v9 = vmul.f32 %v1219_v42, %v1827_v16  ;;  %v1226_v31 = vmul.f32 %v1220_v33, %v1830_v20  ;;  %v1245_v20 = vld [vmem:[%s2169_s6] sm:$0xff]  ;;  %s1294_s6 = sshll.u32 %s1412_s5, 4  ;;  %s1295_s6 = int_to_ptr.vmem [resolvable:$true] %s1294_s6 }
 0x59e   :  { %v1227_v18 = vmul.f32 %v1221_v6, %v1221_v6  ;;  %v1228_v48 = vmul.f32 %v1222_v43, %v1222_v43  ;;  %v1229_v36 = vmul.f32 %v1223_v44, %v1223_v44  ;;  %v1230_v51 = vmul.f32 %v1224_v47, %v1224_v47  ;;  %s1377_s21 = scalar_lea.vmem %s1295_s6, 768  ;;  %p1382_p6 = scmp.lt.s32.totalorder %s1295_s6, %s1295_s6 }
 0x59f   :  { %v1231_v57 = vmul.f32 %v1225_v9, %v1225_v9  ;;  %v1232_v0 = vmul.f32 %v1226_v31, %v1226_v31  ;;  %p1378_p5 = scmp.ne.s32.totalorder %s1295_s6, %s1377_s21  ;;  %p1383_p7 = scmp.lt.s32.totalorder %s1377_s21, %s1377_s21 }
 0x5a0   :  { %v1233_v49 = vadd.f32 %v1228_v48, %v1227_v18 }
 0x5a1   :  { %p1384_p8 = por %p1383_p7, %p1382_p6 }
 0x5a2   :  { %v1234_v52 = vadd.f32 %v1233_v49, %v1229_v36 }
 0x5a3   :  { %p1385_p9 = pnand %p1384_p8, %p1378_p5 }
 0x5a4   :  { %v1235_v58 = vadd.f32 %v1234_v52, %v1230_v51 }
 0x5a6   :  { %v1236_v46 = vadd.f32 %v1235_v58, %v1231_v57 }
 0x5a8   :  { %v1237_v1 = vadd.f32 %v1236_v46, %v1232_v0 }
 0x5aa   :  { %1238 = vadd.xlane.f32.xlu1 %v1237_v1 }
 0x633   :  { %v1239_v11 = vpop.xlane.xlu1 %1238 }
 0x634   :  { %v1240_v59 = vmul.f32 0.001953125, %v1239_v11 }
 0x636   :  { %v1242_v54 = vadd.f32 1e-05, %v1240_v59 }
 0x638   :  { %1349 = vrsqrt.f32 %v1242_v54 }
 0x645   :  { %v1350_v16 = vpop.eup %1349 }
 0x646   :  { %v1244_v2 = vmul.f32 %v1350_v16, %v1241_v13 }
 0x648   :  { %1250 = vperm.xlu0 %1345, %v1244_v2   ;;  %v1246_v21 = vmul.f32 %v1244_v2, %v1214_v37 }
 0x64a   :  { %v1247_v60 = vsub.f32 %v1245_v20, %v1246_v21 }
 0x64c   :  { %1261 = vperm.xlu1 %1346, %v1247_v60  }
 0x6c3   :  { %v1251_v32 = vpop.permute.xlu0 %1250 }
 0x6c4   :  { %v1253_v61 = vmul.f32 %v1251_v32, %v1201_v56  ;;  %v1254_v41 = vmul.f32 %v1251_v32, %v1202_v14  ;;  %v1255_v50 = vmul.f32 %v1251_v32, %v1203_v22  ;;  %v1256_v62 = vmul.f32 %v1251_v32, %v1204_v8  ;;  %v1355_v14 = vld [vmem:[#allocation3 + $0x20] sm:$0xff]  ;;  %v1356_v8 = vld [vmem:[#allocation3 + $0x28] sm:$0xff] }
 0x6c5   :  { %v1257_v7 = vmul.f32 %v1251_v32, %v1205_v3  ;;  %v1258_v12 = vmul.f32 %v1251_v32, %v1206_v28 }
 0x6c7   :  { %v1262_v10 = vpop.permute.xlu1 %1261 }
 0x6c8   :  { %v1264_v45 = vadd.f32 %v1262_v10, %v1253_v61  ;;  %v1265_v15 = vadd.f32 %v1262_v10, %v1254_v41  ;;  %v1266_v17 = vadd.f32 %v1262_v10, %v1255_v50  ;;  %v1267_v19 = vadd.f32 %v1262_v10, %v1256_v62 }
 0x6c9   :  { %v1268_v55 = vadd.f32 %v1262_v10, %v1257_v7  ;;  %v1269_v63 = vadd.f32 %v1262_v10, %v1258_v12 }
 0x6ca   :  { %v1270_v4 = vadd.f32 %v1351_v53, %v1264_v45  ;;  %v1271_v24 = vadd.f32 %v1352_v23, %v1265_v15  ;;  %v1272_v26 = vadd.f32 %v1353_v25, %v1266_v17  ;;  %v1273_v56 = vadd.f32 %v1354_v27, %v1267_v19 }
 0x6cb   :  { %v1274_v22 = vadd.f32 %v1355_v14, %v1268_v55  ;;  %v1275_v3 = vadd.f32 %v1356_v8, %v1269_v63 }
 0x6cc   :  { %v1276_v29 = vmax.f32 %v1270_v4, 0.0  ;;  %v1277_v28 = vmax.f32 %v1271_v24, 0.0  ;;  %v1278_v30 = vmax.f32 %v1272_v26, 0.0  ;;  %v1279_v5 = vmax.f32 %v1273_v56, 0.0 }
 0x6cd   :  { %v1280_v35 = vmax.f32 %v1274_v22, 0.0  ;;  %v1281_v37 = vmax.f32 %v1275_v3, 0.0 }
 0x6ce   :  { %1282 = vst [vmem:[#allocation6] sm:$0xff] %v1276_v29  ;;  %1283 = vst [vmem:[#allocation6 + $0x8] sm:$0xff] %v1277_v28 }
 0x6cf   :  { %1284 = vst [vmem:[#allocation6 + $0x10] sm:$0xff] %v1278_v30  ;;  %1285 = vst [vmem:[#allocation6 + $0x18] sm:$0xff] %v1279_v5 }
 0x6d0   :  { %1286 = vst [vmem:[#allocation6 + $0x20] sm:$0xff] %v1280_v35  ;;  %1287 = vst [vmem:[#allocation6 + $0x28] sm:$0xff] %v1281_v37 }
 0x6d1   :  { %1388 = shalt.err (!%p1385_p9)
}
 0x6d2   :  { %1297 = dma.vmem_to_hbm [thread:$0]  %s1295_s6, 768, %s2170_s7, [#allocation5]  }
 0x6d3   :  { %1399 = dma.done.wait [#allocation5], 768  }
 0x6d4   :  { %1400 = vsyncadd [#allocation5], 4294966528 }
 0x6d5   :  { %1301 = vsyncpa [#allocation4], 1 }
 0x6d6   :  { %1302 = vsyncpa [#allocation5], 1 }

</bundles_post_ra>
